<compile_context>
chip_gen: v7x
topology: tpu7x:2x2x1
jax: 0.10.0
libtpu: 0.0.40
codegen_flags: <defaults>
</compile_context>

<pallas_src>
import functools

import jax
import jax.numpy as jnp
from jax import lax
from jax.experimental import pallas as pl
from jax.experimental.pallas import tpu as pltpu


# ----------------------------- Pallas kernel ---------------------------------

def _fused_patch_kernel(act_ref, img_ref, patch_ref, pyv_ref, pxv_ref, out_ref,
                        *, exact_zero_transparent: bool):
    # act_ref:   (N * n_tiles_h * M,) int32, SMEM (scalar prefetch)
    # img_ref:   (C, th, W)        image row-tile
    # patch_ref: (M, C, Hp, Wp)    per-slot patches for this image (bf16, tiny)
    # pyv_ref:   (th, M) int32     patch-row index per tile row (== Hp outside bbox)
    # pxv_ref:   (M, W)  int32     patch-col index per image col (== Wp outside bbox)
    # out_ref:   (C, th, W)
    M, C, Hp, Wp = patch_ref.shape
    th, W = img_ref.shape[1], img_ref.shape[2]

    n = pl.program_id(0)
    h = pl.program_id(1)
    n_th = pl.num_programs(1)
    base = (n * n_th + h) * M

    # Start from the image tile; active slots read-modify-write this block.
    out_ref[...] = img_ref[...]

    pyv = pyv_ref[...]                                   # (th, M) int32 (tiny)
    pxv = pxv_ref[...]                                   # (M, W)  int32 (small)

    # Hoisted iotas (JAX does not CSE broadcasts across loop iterations).
    iota_y = lax.broadcasted_iota(jnp.int32, (C, th, Hp), 2)
    iota_x = lax.broadcasted_iota(jnp.int32, (Wp, W), 0)

    # M = max #bboxes per image: small and static at trace time.
    for m in range(M):
        @pl.when(act_ref[base + m] != 0)
        def _apply(m=m):
            pyv_m = pyv[:, m:m + 1]                      # (th, 1)
            pxv_m = pxv[m:m + 1, :]                      # (1, W)

            # One-hot selectors in bf16 (0/1 are exact). Sentinel Hp / Wp never
            # matches the iota -> zero rows/cols -> canvas is 0 outside bbox.
            ry = (pyv_m[None] == iota_y).astype(jnp.bfloat16)   # (C, th, Hp)
            rx = (pxv_m == iota_x).astype(jnp.bfloat16)         # (Wp, W)
            patch_m = patch_ref[m]                               # (C, Hp, Wp) bf16

            # Nearest-neighbour resize via one-hot matmuls on the otherwise
            # idle MXU: tiny batched row selection, then one flattened 2-D dot
            # for the dominant column expansion (no broadcast_to copies).
            tmp = jnp.einsum('cyi,cij->cyj', ry, patch_m,
                             preferred_element_type=jnp.float32)  # (C, th, Wp)
            canvas = jnp.dot(tmp.reshape(C * th, Wp).astype(jnp.bfloat16), rx,
                             preferred_element_type=jnp.float32)  # (C*th, W)

            if exact_zero_transparent:
                # Bit-exact ares semantics: patch pixels == 0 stay transparent.
                for c in range(C):
                    cc = canvas[c * th:(c + 1) * th, :]
                    out_ref[c] = jnp.where(cc != 0.0,
                                           cc.astype(out_ref.dtype), out_ref[c])
            else:
                # Geometric inside-bbox mask from sentinels (drops the full
                # (C, th, W) f32 compare). Later slots override earlier ones,
                # same order as the torch.unbind loop.
                sel = (pyv_m != Hp) & (pxv_m != Wp)              # (th, W)
                for c in range(C):
                    cc = canvas[c * th:(c + 1) * th, :]
                    out_ref[c] = jnp.where(sel,
                                           cc.astype(out_ref.dtype), out_ref[c])


# ------------------------------ wrapper ---------------------------------------

def _round_up(x, m):
    return ((x + m - 1) // m) * m


def _pick_tile_rows(C, H, W, itemsize, target_bytes=2 * 1024 * 1024):
    """Largest row-tile (dtype-aware sublane granularity) near ~target bytes."""
    gran = 8 * max(1, 4 // max(1, itemsize))      # 8 rows f32, 16 bf16, 32 int8
    th = max(gran, target_bytes // max(1, C * W * itemsize))
    th -= th % gran
    return int(min(th, _round_up(H, gran)))


def apply_patches_pallas(img_batch, adv_patch_batch, pyv, pxv, *,
                         tile_rows=None, exact_zero_transparent=False):
    """Fused ScalePatchesToBoxes + apply_patch over the M bbox slots."""
    N, C, H, W = img_batch.shape
    _, M, _, Hp, Wp = adv_patch_batch.shape
    itemsize = jnp.dtype(img_batch.dtype).itemsize
    gran = 8 * max(1, 4 // max(1, itemsize))

    # Lane-dense output: pad W to a multiple of 128; pad H to a multiple of th
    # (no th=H fallback for awkward H). Both are cropped after the kernel.
    W_pad = _round_up(W, 128)
    if tile_rows is not None:
        th = _round_up(int(tile_rows), gran)
    else:
        th = _pick_tile_rows(C, H, W_pad, itemsize)
    H_pad = _round_up(H, th)
    n_th = H_pad // th

    img_in = img_batch
    if (H_pad, W_pad) != (H, W):
        img_in = jnp.pad(img_batch,
                         ((0, 0), (0, 0), (0, H_pad - H), (0, W_pad - W)))
    if H_pad != H:
        pyv = jnp.pad(pyv, ((0, 0), (0, H_pad - H), (0, 0)), constant_values=Hp)
    if W_pad != W:
        pxv = jnp.pad(pxv, ((0, 0), (0, 0), (0, W_pad - W)), constant_values=Wp)

    # Activity table: slot m touches row-tile h (and the bbox has width > 0).
    row_hit = (pyv != Hp).reshape(N, n_th, th, M).any(axis=2)      # [N, n_th, M]
    col_hit = (pxv != Wp).any(axis=2)                              # [N, M]
    active = (row_hit & col_hit[:, None, :]).astype(jnp.int32).reshape(-1)

    # bf16 patches (one-hot selection is exact; accumulation stays f32).
    patches_bf16 = adv_patch_batch.astype(jnp.bfloat16)

    kernel = functools.partial(_fused_patch_kernel,
                               exact_zero_transparent=exact_zero_transparent)
    # grid = (N, row tiles); h innermost so patch / pxv blocks are not re-DMA'd
    # per row-tile. Both axes are parallel (megacore sharding on v7x).
    out = pl.pallas_call(
        kernel,
        out_shape=jax.ShapeDtypeStruct((N, C, H_pad, W_pad), img_batch.dtype),
        grid_spec=pltpu.PrefetchScalarGridSpec(
            num_scalar_prefetch=1,
            grid=(N, n_th),
            in_specs=[
                pl.BlockSpec((pl.Squeezed(), C, th, W_pad),
                             lambda n, h, act: (n, 0, h, 0)),
                pl.BlockSpec((pl.Squeezed(), M, C, Hp, Wp),
                             lambda n, h, act: (n, 0, 0, 0, 0)),
                pl.BlockSpec((pl.Squeezed(), th, M),
                             lambda n, h, act: (n, h, 0)),
                pl.BlockSpec((pl.Squeezed(), M, W_pad),
                             lambda n, h, act: (n, 0, 0)),
            ],
            out_specs=pl.BlockSpec((pl.Squeezed(), C, th, W_pad),
                                   lambda n, h, act: (n, 0, h, 0)),
        ),
        compiler_params=pltpu.CompilerParams(
            dimension_semantics=("parallel", "parallel"),
            vmem_limit_bytes=32 * 1024 * 1024),   # v7x-safe (64 MiB physical)
    )(active, img_in, patches_bf16, pyv, pxv)

    if (H_pad, W_pad) != (H, W):
        out = out[:, :, :H, :W]
    return out


# ------------------------------ JAX glue --------------------------------------

def pad_patches_boxes(adv_patch, bboxes_list, labels_list, max_num):
    """Gather per-label patches and zero-pad to max_num bboxes per image."""
    selected, padded = [], []
    for bboxes, labels in zip(bboxes_list, labels_list):
        patches = adv_patch[labels]                                 # [k, C, Hp, Wp]
        k = patches.shape[0]
        pad_p = jnp.zeros((max_num - k,) + patches.shape[1:], patches.dtype)
        selected.append(jnp.concatenate([patches, pad_p], axis=0))
        pad_b = jnp.zeros((max_num - k, 4), bboxes.dtype)
        padded.append(jnp.concatenate([bboxes, pad_b], axis=0))
    return jnp.stack(selected), jnp.stack(padded)


def _sampling_indices(bboxes_px, H, W, Hp, Wp):
    """Per-(image, slot) nearest-neighbour sampling tables.

    Returns pyv [N, H, M] and pxv [N, M, W] int32 where the value is the patch
    row/col to sample, or the sentinel Hp / Wp when the pixel is outside bbox.
    """
    x1, y1 = bboxes_px[..., 0], bboxes_px[..., 1]
    x2, y2 = bboxes_px[..., 2], bboxes_px[..., 3]
    bw = jnp.maximum(x2 - x1, 1e-6)
    bh = jnp.maximum(y2 - y1, 1e-6)
    ys = jnp.arange(H, dtype=jnp.float32) + 0.5
    xs = jnp.arange(W, dtype=jnp.float32) + 0.5
    v = (ys[None, None, :] - y1[..., None]) / bh[..., None]          # [N, M, H]
    u = (xs[None, None, :] - x1[..., None]) / bw[..., None]          # [N, M, W]
    py = jnp.clip(jnp.floor(v * Hp), 0, Hp - 1).astype(jnp.int32)
    px = jnp.clip(jnp.floor(u * Wp), 0, Wp - 1).astype(jnp.int32)
    py = jnp.where((v >= 0.0) & (v < 1.0), py, Hp)
    px = jnp.where((u >= 0.0) & (u < 1.0), px, Wp)
    return jnp.transpose(py, (0, 2, 1)), px                          # [N,H,M], [N,M,W]


class PatchApplier:
    """JAX/Pallas re-implementation of ares PatchApplier.forward."""

    def __init__(self, bbox_coordinate_mode=None, tile_rows=None,
                 exact_zero_transparent=False):
        # 'pixel' | 'normed' | None (None => traced detection, no host sync).
        self.bbox_coordinate_mode = bbox_coordinate_mode
        self.tile_rows = tile_rows
        self.exact_zero_transparent = exact_zero_transparent
        # TODO(synk): the config-driven Registry transform pipeline (random
        # rotation / brightness / median-pool) is reduced to ScalePatchesToBoxes.

    def __call__(self, img_batch, adv_patch, bboxes_list, labels_list):
        max_num = max(int(b.shape[0]) for b in bboxes_list)
        if max_num == 0:
            return img_batch

        adv_patch_batch, padded_bboxes = pad_patches_boxes(
            adv_patch, bboxes_list, labels_list, max_num)
        H, W = img_batch.shape[-2:]
        Hp, Wp = adv_patch.shape[-2:]

        if self.bbox_coordinate_mode == 'pixel':
            bboxes_px = padded_bboxes
        elif self.bbox_coordinate_mode == 'normed':
            bboxes_px = padded_bboxes * jnp.array([W, H, W, H], padded_bboxes.dtype)
        else:
            # Traced mode detection: no device->host sync on the launch path.
            is_pixel = jnp.max(padded_bboxes) > 1.0001
            scale = jnp.where(is_pixel,
                              jnp.ones((4,), padded_bboxes.dtype),
                              jnp.array([W, H, W, H], padded_bboxes.dtype))
            bboxes_px = padded_bboxes * scale
            # TODO(synk): the original raises ValueError for unsupported bbox
            # ranges (min < 0); a traced check cannot raise without a host sync.

        pyv, pxv = _sampling_indices(bboxes_px, H, W, Hp, Wp)
        return apply_patches_pallas(
            img_batch, adv_patch_batch, pyv, pxv,
            tile_rows=self.tile_rows,
            exact_zero_transparent=self.exact_zero_transparent)


# --------------------------- pure-JAX reference --------------------------------

def reference_scale_patches_to_boxes(adv_patch_batch, bboxes_px, H, W):
    """Un-fused gather-based reference: [N, M, C, H, W] canvases."""
    N, M, C, Hp, Wp = adv_patch_batch.shape
    ys = jnp.arange(H, dtype=jnp.float32) + 0.5
    xs = jnp.arange(W, dtype=jnp.float32) + 0.5

    def per_box(patch, box):
        x1, y1, x2, y2 = box[0], box[1], box[2], box[3]
        bw = jnp.maximum(x2 - x1, 1e-6)
        bh = jnp.maximum(y2 - y1, 1e-6)
        u = (xs - x1) / bw
        v = (ys - y1) / bh
        inside = ((v >= 0.0) & (v < 1.0))[:, None] & ((u >= 0.0) & (u < 1.0))[None, :]
        px = jnp.clip(jnp.floor(u * Wp), 0, Wp - 1).astype(jnp.int32)
        py = jnp.clip(jnp.floor(v * Hp), 0, Hp - 1).astype(jnp.int32)
        sampled = patch[:, py[:, None], px[None, :]]
        return jnp.where(inside[None, :, :], sampled, 0.0)

    return jax.vmap(jax.vmap(per_box))(adv_patch_batch, bboxes_px)


# ------------------------------ test driver -----------------------------------

if __name__ == "__main__":
    key = jax.random.PRNGKey(0)
    k_img, k_patch = jax.random.split(key)

    N, C, H, W = 2, 3, 64, 128
    num_classes, Hp, Wp = 4, 16, 16

    img_batch = jax.random.uniform(k_img, (N, C, H, W), dtype=jnp.float32)
    # Strictly-positive patch pixels so 0 marks "no patch" (ares semantics);
    # quantized to bf16-representable values so the bf16 one-hot MXU selection
    # is bit-exact vs the f32 reference.
    adv_patch = 0.1 + 0.8 * jax.random.uniform(
        k_patch, (num_classes, C, Hp, Wp), dtype=jnp.float32)
    adv_patch = adv_patch.astype(jnp.bfloat16).astype(jnp.float32)

    # Normalized-coordinate bboxes (x1, y1, x2, y2); variable count per image.
    bboxes_list = [
        jnp.array([[0.10, 0.10, 0.50, 0.60],
                   [0.40, 0.30, 0.90, 0.80],
                   [0.00, 0.55, 0.30, 0.95]], dtype=jnp.float32),
        jnp.array([[0.20, 0.20, 0.70, 0.70],
                   [0.55, 0.05, 0.95, 0.45]], dtype=jnp.float32),
    ]
    labels_list = [
        jnp.array([0, 2, 3], dtype=jnp.int32),
        jnp.array([1, 3], dtype=jnp.int32),
    ]

    # tile_rows=16 -> 4 row tiles: exercises the SMEM activity table and the
    # per-(tile, slot) pl.when skip path.
    applier = PatchApplier(tile_rows=16)
    out = jax.block_until_ready(
        applier(img_batch, adv_patch, bboxes_list, labels_list))

    # Un-fused pure-JAX reference (gather-based resize + where-chain).
    adv_patch_batch, padded_bboxes = pad_patches_boxes(
        adv_patch, bboxes_list, labels_list, 3)
    bboxes_px = padded_bboxes * jnp.array([W, H, W, H], dtype=jnp.float32)
    canvases = reference_scale_patches_to_boxes(adv_patch_batch, bboxes_px, H, W)
    ref = img_batch
    for m in range(canvases.shape[1]):
        adv = canvases[:, m]
        ref = jnp.where(adv == 0.0, ref, adv)

    assert out.shape == img_batch.shape and out.dtype == img_batch.dtype
    assert jnp.allclose(out, ref, atol=1e-6), "Pallas output mismatch vs reference"

    # Also exercise auto tile sizing + the bit-exact zero-transparency path.
    pyv, pxv = _sampling_indices(bboxes_px, H, W, Hp, Wp)
    out2 = jax.block_until_ready(apply_patches_pallas(
        img_batch, adv_patch_batch, pyv, pxv, exact_zero_transparent=True))
    assert jnp.allclose(out2, ref, atol=1e-6), "exact-zero path mismatch"

    print("KERNEL_OK")
</pallas_src>

<mosaic_0001>
module attributes {stable_mosaic.version = 11 : i64} {
  func.func @_fused_patch_kernel(%arg0: i32, %arg1: i32, %arg2: memref<24xi32, #tpu.memory_space<smem>>, %arg3: memref<1x3x16x128xf32, #tpu.memory_space<vmem>>, %arg4: memref<1x3x3x16x16xbf16, #tpu.memory_space<vmem>>, %arg5: memref<1x16x3xi32, #tpu.memory_space<vmem>>, %arg6: memref<1x3x128xi32, #tpu.memory_space<vmem>>, %arg7: memref<1x3x16x128xf32, #tpu.memory_space<vmem>>) attributes {dimension_semantics = [#tpu.dimension_semantics<parallel>, #tpu.dimension_semantics<parallel>], iteration_bounds = array<i64: 2, 4>, scalar_prefetch = 1 : i64, scratch_operands = 0 : i64, tpu.core_type = #tpu.core_type<tc>, window_params = [{transform_indices = @transform_0, window_bounds = array<i64: 1, 3, 16, 128>}, {transform_indices = @transform_1, window_bounds = array<i64: 1, 3, 3, 16, 16>}, {transform_indices = @transform_2, window_bounds = array<i64: 1, 16, 3>}, {transform_indices = @transform_3, window_bounds = array<i64: 1, 3, 128>}, {transform_indices = @transform_4, window_bounds = array<i64: 1, 3, 16, 128>}]} {
    %c4_i32 = arith.constant 4 : i32
    %0 = arith.muli %arg0, %c4_i32 : i32
    %1 = arith.addi %0, %arg1 : i32
    %c3_i32 = arith.constant 3 : i32
    %2 = arith.muli %1, %c3_i32 : i32
    %c0 = arith.constant 0 : index
    %c0_0 = arith.constant 0 : index
    %c0_1 = arith.constant 0 : index
    %c0_2 = arith.constant 0 : index
    %3 = vector.load %arg3[%c0, %c0_0, %c0_1, %c0_2] : memref<1x3x16x128xf32, #tpu.memory_space<vmem>>, vector<1x3x16x128xf32>
    %4 = vector.shape_cast %3 : vector<1x3x16x128xf32> to vector<3x16x128xf32>
    %c0_3 = arith.constant 0 : index
    %c0_4 = arith.constant 0 : index
    %c0_5 = arith.constant 0 : index
    %c0_6 = arith.constant 0 : index
    %5 = vector.load %arg7[%c0_3, %c0_4, %c0_5, %c0_6] : memref<1x3x16x128xf32, #tpu.memory_space<vmem>>, vector<1x3x16x128xf32>
    %6 = vector.shape_cast %5 : vector<1x3x16x128xf32> to vector<3x16x128xf32>
    %7 = vector.shape_cast %4 : vector<3x16x128xf32> to vector<1x3x16x128xf32>
    tpu.vector_store %arg7[%c0_3, %c0_4, %c0_5, %c0_6], %7 {strides = array<i32>} : memref<1x3x16x128xf32, #tpu.memory_space<vmem>>, vector<1x3x16x128xf32>,
    %c0_7 = arith.constant 0 : index
    %c0_8 = arith.constant 0 : index
    %c0_9 = arith.constant 0 : index
    %8 = vector.load %arg5[%c0_7, %c0_8, %c0_9] : memref<1x16x3xi32, #tpu.memory_space<vmem>>, vector<1x16x3xi32>
    %9 = vector.shape_cast %8 : vector<1x16x3xi32> to vector<16x3xi32>
    %c0_10 = arith.constant 0 : index
    %c0_11 = arith.constant 0 : index
    %c0_12 = arith.constant 0 : index
    %10 = vector.load %arg6[%c0_10, %c0_11, %c0_12] : memref<1x3x128xi32, #tpu.memory_space<vmem>>, vector<1x3x128xi32>
    %11 = vector.shape_cast %10 : vector<1x3x128xi32> to vector<3x128xi32>
    %12 = tpu.iota {dimensions = array<i32: 2>} : vector<3x16x16xi32>
    %13 = tpu.iota {dimensions = array<i32: 0>} : vector<16x128xi32>
    %c0_i32 = arith.constant 0 : i32
    %14 = arith.addi %2, %c0_i32 : i32
    %15 = arith.index_cast %14 : i32 to index
    %16 = memref.load %arg2[%15] : memref<24xi32, #tpu.memory_space<smem>>
    %c0_i32_13 = arith.constant 0 : i32
    %17 = arith.cmpi ne, %16, %c0_i32_13 : i32
    %18 = arith.extui %17 : i1 to i32
    %c0_i32_14 = arith.constant 0 : i32
    %19 = arith.cmpi ne, %18, %c0_i32_14 : i32
    scf.if %19 {
      %32 = vector.extract_strided_slice %9 {offsets = [0, 0], sizes = [16, 1], strides = [1, 1]} : vector<16x3xi32> to vector<16x1xi32>
      %33 = vector.extract_strided_slice %11 {offsets = [0, 0], sizes = [1, 128], strides = [1, 1]} : vector<3x128xi32> to vector<1x128xi32>
      %34 = vector.shape_cast %32 : vector<16x1xi32> to vector<1x16x1xi32>
      %35 = vector.broadcast %34 : vector<1x16x1xi32> to vector<3x16x16xi32>
      %36 = arith.cmpi eq, %35, %12 : vector<3x16x16xi32>
      %37 = arith.extui %36 : vector<3x16x16xi1> to vector<3x16x16xi32>
      %38 = arith.sitofp %37 : vector<3x16x16xi32> to vector<3x16x16xf32>
      %39 = arith.truncf %38 : vector<3x16x16xf32> to vector<3x16x16xbf16>
      %40 = vector.broadcast %33 : vector<1x128xi32> to vector<16x128xi32>
      %41 = arith.cmpi eq, %40, %13 : vector<16x128xi32>
      %42 = arith.extui %41 : vector<16x128xi1> to vector<16x128xi32>
      %43 = arith.sitofp %42 : vector<16x128xi32> to vector<16x128xf32>
      %44 = arith.truncf %43 : vector<16x128xf32> to vector<16x128xbf16>
      %c0_19 = arith.constant 0 : index
      %c0_20 = arith.constant 0 : index
      %c0_21 = arith.constant 0 : index
      %c0_22 = arith.constant 0 : index
      %c0_23 = arith.constant 0 : index
      %45 = vector.load %arg4[%c0_19, %c0_20, %c0_21, %c0_22, %c0_23] : memref<1x3x3x16x16xbf16, #tpu.memory_space<vmem>>, vector<1x1x3x16x16xbf16>
      %46 = vector.shape_cast %45 : vector<1x1x3x16x16xbf16> to vector<3x16x16xbf16>
      "tpu.trace_start"() <{level = 10 : i32, message = "cyi,cij->cyj"}> : () -> ()
      %cst = arith.constant dense<0.000000e+00> : vector<3x16x16xf32>
      %47 = tpu.matmul %39, %46, %cst {dimension_numbers = #tpu.dot_dimension_numbers<[2], [1], [1], [2], [0, 0, 0, 1, 1, 2], [0], [0]>} : vector<3x16x16xbf16>, vector<3x16x16xbf16>, vector<3x16x16xf32> -> vector<3x16x16xf32>
      "tpu.trace_stop"() : () -> ()
      %48 = vector.shape_cast %47 : vector<3x16x16xf32> to vector<48x16xf32>
      %49 = arith.truncf %48 : vector<48x16xf32> to vector<48x16xbf16>
      %cst_24 = arith.constant dense<0.000000e+00> : vector<48x128xf32>
      %50 = tpu.matmul %49, %44, %cst_24 {dimension_numbers = #tpu.dot_dimension_numbers<[1], [0], [0], [1], [0, 0, 1, 1], [], []>} : vector<48x16xbf16>, vector<16x128xbf16>, vector<48x128xf32> -> vector<48x128xf32>
      %c16_i32 = arith.constant 16 : i32
      %51 = vector.broadcast %c16_i32 : i32 to vector<16x1xi32>
      %52 = arith.cmpi ne, %32, %51 : vector<16x1xi32>
      %c16_i32_25 = arith.constant 16 : i32
      %53 = vector.broadcast %c16_i32_25 : i32 to vector<1x128xi32>
      %54 = arith.cmpi ne, %33, %53 : vector<1x128xi32>
      %55 = vector.broadcast %52 : vector<16x1xi1> to vector<16x128xi1>
      %56 = vector.broadcast %54 : vector<1x128xi1> to vector<16x128xi1>
      %57 = arith.andi %55, %56 : vector<16x128xi1>
      %58 = vector.extract_strided_slice %50 {offsets = [0, 0], sizes = [16, 128], strides = [1, 1]} : vector<48x128xf32> to vector<16x128xf32>
      %c0_26 = arith.constant 0 : index
      %c0_27 = arith.constant 0 : index
      %c0_28 = arith.constant 0 : index
      %c0_29 = arith.constant 0 : index
      %59 = vector.load %arg7[%c0_26, %c0_27, %c0_28, %c0_29] : memref<1x3x16x128xf32, #tpu.memory_space<vmem>>, vector<1x1x16x128xf32>
      %60 = vector.shape_cast %59 : vector<1x1x16x128xf32> to vector<16x128xf32>
      %61 = arith.select %57, %58, %60 : vector<16x128xi1>, vector<16x128xf32>
      %c0_30 = arith.constant 0 : index
      %c0_31 = arith.constant 0 : index
      %c0_32 = arith.constant 0 : index
      %c0_33 = arith.constant 0 : index
      %62 = vector.load %arg7[%c0_30, %c0_31, %c0_32, %c0_33] : memref<1x3x16x128xf32, #tpu.memory_space<vmem>>, vector<1x1x16x128xf32>
      %63 = vector.shape_cast %62 : vector<1x1x16x128xf32> to vector<16x128xf32>
      %64 = vector.shape_cast %61 : vector<16x128xf32> to vector<1x1x16x128xf32>
      tpu.vector_store %arg7[%c0_30, %c0_31, %c0_32, %c0_33], %64 {strides = array<i32>} : memref<1x3x16x128xf32, #tpu.memory_space<vmem>>, vector<1x1x16x128xf32>,
      %65 = vector.extract_strided_slice %50 {offsets = [16, 0], sizes = [16, 128], strides = [1, 1]} : vector<48x128xf32> to vector<16x128xf32>
      %c0_34 = arith.constant 0 : index
      %c1 = arith.constant 1 : index
      %c0_35 = arith.constant 0 : index
      %c0_36 = arith.constant 0 : index
      %66 = vector.load %arg7[%c0_34, %c1, %c0_35, %c0_36] : memref<1x3x16x128xf32, #tpu.memory_space<vmem>>, vector<1x1x16x128xf32>
      %67 = vector.shape_cast %66 : vector<1x1x16x128xf32> to vector<16x128xf32>
      %68 = arith.select %57, %65, %67 : vector<16x128xi1>, vector<16x128xf32>
      %c0_37 = arith.constant 0 : index
      %c1_38 = arith.constant 1 : index
      %c0_39 = arith.constant 0 : index
      %c0_40 = arith.constant 0 : index
      %69 = vector.load %arg7[%c0_37, %c1_38, %c0_39, %c0_40] : memref<1x3x16x128xf32, #tpu.memory_space<vmem>>, vector<1x1x16x128xf32>
      %70 = vector.shape_cast %69 : vector<1x1x16x128xf32> to vector<16x128xf32>
      %71 = vector.shape_cast %68 : vector<16x128xf32> to vector<1x1x16x128xf32>
      tpu.vector_store %arg7[%c0_37, %c1_38, %c0_39, %c0_40], %71 {strides = array<i32>} : memref<1x3x16x128xf32, #tpu.memory_space<vmem>>, vector<1x1x16x128xf32>,
      %72 = vector.extract_strided_slice %50 {offsets = [32, 0], sizes = [16, 128], strides = [1, 1]} : vector<48x128xf32> to vector<16x128xf32>
      %c0_41 = arith.constant 0 : index
      %c2 = arith.constant 2 : index
      %c0_42 = arith.constant 0 : index
      %c0_43 = arith.constant 0 : index
      %73 = vector.load %arg7[%c0_41, %c2, %c0_42, %c0_43] : memref<1x3x16x128xf32, #tpu.memory_space<vmem>>, vector<1x1x16x128xf32>
      %74 = vector.shape_cast %73 : vector<1x1x16x128xf32> to vector<16x128xf32>
      %75 = arith.select %57, %72, %74 : vector<16x128xi1>, vector<16x128xf32>
      %c0_44 = arith.constant 0 : index
      %c2_45 = arith.constant 2 : index
      %c0_46 = arith.constant 0 : index
      %c0_47 = arith.constant 0 : index
      %76 = vector.load %arg7[%c0_44, %c2_45, %c0_46, %c0_47] : memref<1x3x16x128xf32, #tpu.memory_space<vmem>>, vector<1x1x16x128xf32>
      %77 = vector.shape_cast %76 : vector<1x1x16x128xf32> to vector<16x128xf32>
      %78 = vector.shape_cast %75 : vector<16x128xf32> to vector<1x1x16x128xf32>
      tpu.vector_store %arg7[%c0_44, %c2_45, %c0_46, %c0_47], %78 {strides = array<i32>} : memref<1x3x16x128xf32, #tpu.memory_space<vmem>>, vector<1x1x16x128xf32>,
    } else {
    }
    %c1_i32 = arith.constant 1 : i32
    %20 = arith.addi %2, %c1_i32 : i32
    %21 = arith.index_cast %20 : i32 to index
    %22 = memref.load %arg2[%21] : memref<24xi32, #tpu.memory_space<smem>>
    %c0_i32_15 = arith.constant 0 : i32
    %23 = arith.cmpi ne, %22, %c0_i32_15 : i32
    %24 = arith.extui %23 : i1 to i32
    %c0_i32_16 = arith.constant 0 : i32
    %25 = arith.cmpi ne, %24, %c0_i32_16 : i32
    scf.if %25 {
      %32 = vector.extract_strided_slice %9 {offsets = [0, 1], sizes = [16, 1], strides = [1, 1]} : vector<16x3xi32> to vector<16x1xi32>
      %33 = vector.extract_strided_slice %11 {offsets = [1, 0], sizes = [1, 128], strides = [1, 1]} : vector<3x128xi32> to vector<1x128xi32>
      %34 = vector.shape_cast %32 : vector<16x1xi32> to vector<1x16x1xi32>
      %35 = vector.broadcast %34 : vector<1x16x1xi32> to vector<3x16x16xi32>
      %36 = arith.cmpi eq, %35, %12 : vector<3x16x16xi32>
      %37 = arith.extui %36 : vector<3x16x16xi1> to vector<3x16x16xi32>
      %38 = arith.sitofp %37 : vector<3x16x16xi32> to vector<3x16x16xf32>
      %39 = arith.truncf %38 : vector<3x16x16xf32> to vector<3x16x16xbf16>
      %40 = vector.broadcast %33 : vector<1x128xi32> to vector<16x128xi32>
      %41 = arith.cmpi eq, %40, %13 : vector<16x128xi32>
      %42 = arith.extui %41 : vector<16x128xi1> to vector<16x128xi32>
      %43 = arith.sitofp %42 : vector<16x128xi32> to vector<16x128xf32>
      %44 = arith.truncf %43 : vector<16x128xf32> to vector<16x128xbf16>
      %c0_19 = arith.constant 0 : index
      %c1 = arith.constant 1 : index
      %c0_20 = arith.constant 0 : index
      %c0_21 = arith.constant 0 : index
      %c0_22 = arith.constant 0 : index
      %45 = vector.load %arg4[%c0_19, %c1, %c0_20, %c0_21, %c0_22] : memref<1x3x3x16x16xbf16, #tpu.memory_space<vmem>>, vector<1x1x3x16x16xbf16>
      %46 = vector.shape_cast %45 : vector<1x1x3x16x16xbf16> to vector<3x16x16xbf16>
      "tpu.trace_start"() <{level = 10 : i32, message = "cyi,cij->cyj"}> : () -> ()
      %cst = arith.constant dense<0.000000e+00> : vector<3x16x16xf32>
      %47 = tpu.matmul %39, %46, %cst {dimension_numbers = #tpu.dot_dimension_numbers<[2], [1], [1], [2], [0, 0, 0, 1, 1, 2], [0], [0]>} : vector<3x16x16xbf16>, vector<3x16x16xbf16>, vector<3x16x16xf32> -> vector<3x16x16xf32>
      "tpu.trace_stop"() : () -> ()
      %48 = vector.shape_cast %47 : vector<3x16x16xf32> to vector<48x16xf32>
      %49 = arith.truncf %48 : vector<48x16xf32> to vector<48x16xbf16>
      %cst_23 = arith.constant dense<0.000000e+00> : vector<48x128xf32>
      %50 = tpu.matmul %49, %44, %cst_23 {dimension_numbers = #tpu.dot_dimension_numbers<[1], [0], [0], [1], [0, 0, 1, 1], [], []>} : vector<48x16xbf16>, vector<16x128xbf16>, vector<48x128xf32> -> vector<48x128xf32>
      %c16_i32 = arith.constant 16 : i32
      %51 = vector.broadcast %c16_i32 : i32 to vector<16x1xi32>
      %52 = arith.cmpi ne, %32, %51 : vector<16x1xi32>
      %c16_i32_24 = arith.constant 16 : i32
      %53 = vector.broadcast %c16_i32_24 : i32 to vector<1x128xi32>
      %54 = arith.cmpi ne, %33, %53 : vector<1x128xi32>
      %55 = vector.broadcast %52 : vector<16x1xi1> to vector<16x128xi1>
      %56 = vector.broadcast %54 : vector<1x128xi1> to vector<16x128xi1>
      %57 = arith.andi %55, %56 : vector<16x128xi1>
      %58 = vector.extract_strided_slice %50 {offsets = [0, 0], sizes = [16, 128], strides = [1, 1]} : vector<48x128xf32> to vector<16x128xf32>
      %c0_25 = arith.constant 0 : index
      %c0_26 = arith.constant 0 : index
      %c0_27 = arith.constant 0 : index
      %c0_28 = arith.constant 0 : index
      %59 = vector.load %arg7[%c0_25, %c0_26, %c0_27, %c0_28] : memref<1x3x16x128xf32, #tpu.memory_space<vmem>>, vector<1x1x16x128xf32>
      %60 = vector.shape_cast %59 : vector<1x1x16x128xf32> to vector<16x128xf32>
      %61 = arith.select %57, %58, %60 : vector<16x128xi1>, vector<16x128xf32>
      %c0_29 = arith.constant 0 : index
      %c0_30 = arith.constant 0 : index
      %c0_31 = arith.constant 0 : index
      %c0_32 = arith.constant 0 : index
      %62 = vector.load %arg7[%c0_29, %c0_30, %c0_31, %c0_32] : memref<1x3x16x128xf32, #tpu.memory_space<vmem>>, vector<1x1x16x128xf32>
      %63 = vector.shape_cast %62 : vector<1x1x16x128xf32> to vector<16x128xf32>
      %64 = vector.shape_cast %61 : vector<16x128xf32> to vector<1x1x16x128xf32>
      tpu.vector_store %arg7[%c0_29, %c0_30, %c0_31, %c0_32], %64 {strides = array<i32>} : memref<1x3x16x128xf32, #tpu.memory_space<vmem>>, vector<1x1x16x128xf32>,
      %65 = vector.extract_strided_slice %50 {offsets = [16, 0], sizes = [16, 128], strides = [1, 1]} : vector<48x128xf32> to vector<16x128xf32>
      %c0_33 = arith.constant 0 : index
      %c1_34 = arith.constant 1 : index
      %c0_35 = arith.constant 0 : index
      %c0_36 = arith.constant 0 : index
      %66 = vector.load %arg7[%c0_33, %c1_34, %c0_35, %c0_36] : memref<1x3x16x128xf32, #tpu.memory_space<vmem>>, vector<1x1x16x128xf32>
      %67 = vector.shape_cast %66 : vector<1x1x16x128xf32> to vector<16x128xf32>
      %68 = arith.select %57, %65, %67 : vector<16x128xi1>, vector<16x128xf32>
      %c0_37 = arith.constant 0 : index
      %c1_38 = arith.constant 1 : index
      %c0_39 = arith.constant 0 : index
      %c0_40 = arith.constant 0 : index
      %69 = vector.load %arg7[%c0_37, %c1_38, %c0_39, %c0_40] : memref<1x3x16x128xf32, #tpu.memory_space<vmem>>, vector<1x1x16x128xf32>
      %70 = vector.shape_cast %69 : vector<1x1x16x128xf32> to vector<16x128xf32>
      %71 = vector.shape_cast %68 : vector<16x128xf32> to vector<1x1x16x128xf32>
      tpu.vector_store %arg7[%c0_37, %c1_38, %c0_39, %c0_40], %71 {strides = array<i32>} : memref<1x3x16x128xf32, #tpu.memory_space<vmem>>, vector<1x1x16x128xf32>,
      %72 = vector.extract_strided_slice %50 {offsets = [32, 0], sizes = [16, 128], strides = [1, 1]} : vector<48x128xf32> to vector<16x128xf32>
      %c0_41 = arith.constant 0 : index
      %c2 = arith.constant 2 : index
      %c0_42 = arith.constant 0 : index
      %c0_43 = arith.constant 0 : index
      %73 = vector.load %arg7[%c0_41, %c2, %c0_42, %c0_43] : memref<1x3x16x128xf32, #tpu.memory_space<vmem>>, vector<1x1x16x128xf32>
      %74 = vector.shape_cast %73 : vector<1x1x16x128xf32> to vector<16x128xf32>
      %75 = arith.select %57, %72, %74 : vector<16x128xi1>, vector<16x128xf32>
      %c0_44 = arith.constant 0 : index
      %c2_45 = arith.constant 2 : index
      %c0_46 = arith.constant 0 : index
      %c0_47 = arith.constant 0 : index
      %76 = vector.load %arg7[%c0_44, %c2_45, %c0_46, %c0_47] : memref<1x3x16x128xf32, #tpu.memory_space<vmem>>, vector<1x1x16x128xf32>
      %77 = vector.shape_cast %76 : vector<1x1x16x128xf32> to vector<16x128xf32>
      %78 = vector.shape_cast %75 : vector<16x128xf32> to vector<1x1x16x128xf32>
      tpu.vector_store %arg7[%c0_44, %c2_45, %c0_46, %c0_47], %78 {strides = array<i32>} : memref<1x3x16x128xf32, #tpu.memory_space<vmem>>, vector<1x1x16x128xf32>,
    } else {
    }
    %c2_i32 = arith.constant 2 : i32
    %26 = arith.addi %2, %c2_i32 : i32
    %27 = arith.index_cast %26 : i32 to index
    %28 = memref.load %arg2[%27] : memref<24xi32, #tpu.memory_space<smem>>
    %c0_i32_17 = arith.constant 0 : i32
    %29 = arith.cmpi ne, %28, %c0_i32_17 : i32
    %30 = arith.extui %29 : i1 to i32
    %c0_i32_18 = arith.constant 0 : i32
    %31 = arith.cmpi ne, %30, %c0_i32_18 : i32
    scf.if %31 {
      %32 = vector.extract_strided_slice %9 {offsets = [0, 2], sizes = [16, 1], strides = [1, 1]} : vector<16x3xi32> to vector<16x1xi32>
      %33 = vector.extract_strided_slice %11 {offsets = [2, 0], sizes = [1, 128], strides = [1, 1]} : vector<3x128xi32> to vector<1x128xi32>
      %34 = vector.shape_cast %32 : vector<16x1xi32> to vector<1x16x1xi32>
      %35 = vector.broadcast %34 : vector<1x16x1xi32> to vector<3x16x16xi32>
      %36 = arith.cmpi eq, %35, %12 : vector<3x16x16xi32>
      %37 = arith.extui %36 : vector<3x16x16xi1> to vector<3x16x16xi32>
      %38 = arith.sitofp %37 : vector<3x16x16xi32> to vector<3x16x16xf32>
      %39 = arith.truncf %38 : vector<3x16x16xf32> to vector<3x16x16xbf16>
      %40 = vector.broadcast %33 : vector<1x128xi32> to vector<16x128xi32>
      %41 = arith.cmpi eq, %40, %13 : vector<16x128xi32>
      %42 = arith.extui %41 : vector<16x128xi1> to vector<16x128xi32>
      %43 = arith.sitofp %42 : vector<16x128xi32> to vector<16x128xf32>
      %44 = arith.truncf %43 : vector<16x128xf32> to vector<16x128xbf16>
      %c0_19 = arith.constant 0 : index
      %c2 = arith.constant 2 : index
      %c0_20 = arith.constant 0 : index
      %c0_21 = arith.constant 0 : index
      %c0_22 = arith.constant 0 : index
      %45 = vector.load %arg4[%c0_19, %c2, %c0_20, %c0_21, %c0_22] : memref<1x3x3x16x16xbf16, #tpu.memory_space<vmem>>, vector<1x1x3x16x16xbf16>
      %46 = vector.shape_cast %45 : vector<1x1x3x16x16xbf16> to vector<3x16x16xbf16>
      "tpu.trace_start"() <{level = 10 : i32, message = "cyi,cij->cyj"}> : () -> ()
      %cst = arith.constant dense<0.000000e+00> : vector<3x16x16xf32>
      %47 = tpu.matmul %39, %46, %cst {dimension_numbers = #tpu.dot_dimension_numbers<[2], [1], [1], [2], [0, 0, 0, 1, 1, 2], [0], [0]>} : vector<3x16x16xbf16>, vector<3x16x16xbf16>, vector<3x16x16xf32> -> vector<3x16x16xf32>
      "tpu.trace_stop"() : () -> ()
      %48 = vector.shape_cast %47 : vector<3x16x16xf32> to vector<48x16xf32>
      %49 = arith.truncf %48 : vector<48x16xf32> to vector<48x16xbf16>
      %cst_23 = arith.constant dense<0.000000e+00> : vector<48x128xf32>
      %50 = tpu.matmul %49, %44, %cst_23 {dimension_numbers = #tpu.dot_dimension_numbers<[1], [0], [0], [1], [0, 0, 1, 1], [], []>} : vector<48x16xbf16>, vector<16x128xbf16>, vector<48x128xf32> -> vector<48x128xf32>
      %c16_i32 = arith.constant 16 : i32
      %51 = vector.broadcast %c16_i32 : i32 to vector<16x1xi32>
      %52 = arith.cmpi ne, %32, %51 : vector<16x1xi32>
      %c16_i32_24 = arith.constant 16 : i32
      %53 = vector.broadcast %c16_i32_24 : i32 to vector<1x128xi32>
      %54 = arith.cmpi ne, %33, %53 : vector<1x128xi32>
      %55 = vector.broadcast %52 : vector<16x1xi1> to vector<16x128xi1>
      %56 = vector.broadcast %54 : vector<1x128xi1> to vector<16x128xi1>
      %57 = arith.andi %55, %56 : vector<16x128xi1>
      %58 = vector.extract_strided_slice %50 {offsets = [0, 0], sizes = [16, 128], strides = [1, 1]} : vector<48x128xf32> to vector<16x128xf32>
      %c0_25 = arith.constant 0 : index
      %c0_26 = arith.constant 0 : index
      %c0_27 = arith.constant 0 : index
      %c0_28 = arith.constant 0 : index
      %59 = vector.load %arg7[%c0_25, %c0_26, %c0_27, %c0_28] : memref<1x3x16x128xf32, #tpu.memory_space<vmem>>, vector<1x1x16x128xf32>
      %60 = vector.shape_cast %59 : vector<1x1x16x128xf32> to vector<16x128xf32>
      %61 = arith.select %57, %58, %60 : vector<16x128xi1>, vector<16x128xf32>
      %c0_29 = arith.constant 0 : index
      %c0_30 = arith.constant 0 : index
      %c0_31 = arith.constant 0 : index
      %c0_32 = arith.constant 0 : index
      %62 = vector.load %arg7[%c0_29, %c0_30, %c0_31, %c0_32] : memref<1x3x16x128xf32, #tpu.memory_space<vmem>>, vector<1x1x16x128xf32>
      %63 = vector.shape_cast %62 : vector<1x1x16x128xf32> to vector<16x128xf32>
      %64 = vector.shape_cast %61 : vector<16x128xf32> to vector<1x1x16x128xf32>
      tpu.vector_store %arg7[%c0_29, %c0_30, %c0_31, %c0_32], %64 {strides = array<i32>} : memref<1x3x16x128xf32, #tpu.memory_space<vmem>>, vector<1x1x16x128xf32>,
      %65 = vector.extract_strided_slice %50 {offsets = [16, 0], sizes = [16, 128], strides = [1, 1]} : vector<48x128xf32> to vector<16x128xf32>
      %c0_33 = arith.constant 0 : index
      %c1 = arith.constant 1 : index
      %c0_34 = arith.constant 0 : index
      %c0_35 = arith.constant 0 : index
      %66 = vector.load %arg7[%c0_33, %c1, %c0_34, %c0_35] : memref<1x3x16x128xf32, #tpu.memory_space<vmem>>, vector<1x1x16x128xf32>
      %67 = vector.shape_cast %66 : vector<1x1x16x128xf32> to vector<16x128xf32>
      %68 = arith.select %57, %65, %67 : vector<16x128xi1>, vector<16x128xf32>
      %c0_36 = arith.constant 0 : index
      %c1_37 = arith.constant 1 : index
      %c0_38 = arith.constant 0 : index
      %c0_39 = arith.constant 0 : index
      %69 = vector.load %arg7[%c0_36, %c1_37, %c0_38, %c0_39] : memref<1x3x16x128xf32, #tpu.memory_space<vmem>>, vector<1x1x16x128xf32>
      %70 = vector.shape_cast %69 : vector<1x1x16x128xf32> to vector<16x128xf32>
      %71 = vector.shape_cast %68 : vector<16x128xf32> to vector<1x1x16x128xf32>
      tpu.vector_store %arg7[%c0_36, %c1_37, %c0_38, %c0_39], %71 {strides = array<i32>} : memref<1x3x16x128xf32, #tpu.memory_space<vmem>>, vector<1x1x16x128xf32>,
      %72 = vector.extract_strided_slice %50 {offsets = [32, 0], sizes = [16, 128], strides = [1, 1]} : vector<48x128xf32> to vector<16x128xf32>
      %c0_40 = arith.constant 0 : index
      %c2_41 = arith.constant 2 : index
      %c0_42 = arith.constant 0 : index
      %c0_43 = arith.constant 0 : index
      %73 = vector.load %arg7[%c0_40, %c2_41, %c0_42, %c0_43] : memref<1x3x16x128xf32, #tpu.memory_space<vmem>>, vector<1x1x16x128xf32>
      %74 = vector.shape_cast %73 : vector<1x1x16x128xf32> to vector<16x128xf32>
      %75 = arith.select %57, %72, %74 : vector<16x128xi1>, vector<16x128xf32>
      %c0_44 = arith.constant 0 : index
      %c2_45 = arith.constant 2 : index
      %c0_46 = arith.constant 0 : index
      %c0_47 = arith.constant 0 : index
      %76 = vector.load %arg7[%c0_44, %c2_45, %c0_46, %c0_47] : memref<1x3x16x128xf32, #tpu.memory_space<vmem>>, vector<1x1x16x128xf32>
      %77 = vector.shape_cast %76 : vector<1x1x16x128xf32> to vector<16x128xf32>
      %78 = vector.shape_cast %75 : vector<16x128xf32> to vector<1x1x16x128xf32>
      tpu.vector_store %arg7[%c0_44, %c2_45, %c0_46, %c0_47], %78 {strides = array<i32>} : memref<1x3x16x128xf32, #tpu.memory_space<vmem>>, vector<1x1x16x128xf32>,
    } else {
    }
    return
  }
  func.func @transform_0(%arg0: i32, %arg1: i32, %arg2: memref<24xi32, #tpu.memory_space<smem>>) -> (i32, i32, i32, i32) {
    %c0_i32 = arith.constant 0 : i32
    %c0_i32_0 = arith.constant 0 : i32
    %c0_i32_1 = arith.constant 0 : i32
    return %arg0, %c0_i32, %arg1, %c0_i32_0 : i32, i32, i32, i32
  }
  func.func @transform_1(%arg0: i32, %arg1: i32, %arg2: memref<24xi32, #tpu.memory_space<smem>>) -> (i32, i32, i32, i32, i32) {
    %c0_i32 = arith.constant 0 : i32
    %c0_i32_0 = arith.constant 0 : i32
    %c0_i32_1 = arith.constant 0 : i32
    %c0_i32_2 = arith.constant 0 : i32
    %c0_i32_3 = arith.constant 0 : i32
    return %arg0, %c0_i32, %c0_i32_0, %c0_i32_1, %c0_i32_2 : i32, i32, i32, i32, i32
  }
  func.func @transform_2(%arg0: i32, %arg1: i32, %arg2: memref<24xi32, #tpu.memory_space<smem>>) -> (i32, i32, i32) {
    %c0_i32 = arith.constant 0 : i32
    %c0_i32_0 = arith.constant 0 : i32
    return %arg0, %arg1, %c0_i32 : i32, i32, i32
  }
  func.func @transform_3(%arg0: i32, %arg1: i32, %arg2: memref<24xi32, #tpu.memory_space<smem>>) -> (i32, i32, i32) {
    %c0_i32 = arith.constant 0 : i32
    %c0_i32_0 = arith.constant 0 : i32
    %c0_i32_1 = arith.constant 0 : i32
    return %arg0, %c0_i32, %c0_i32_0 : i32, i32, i32
  }
  func.func @transform_4(%arg0: i32, %arg1: i32, %arg2: memref<24xi32, #tpu.memory_space<smem>>) -> (i32, i32, i32, i32) {
    %c0_i32 = arith.constant 0 : i32
    %c0_i32_0 = arith.constant 0 : i32
    %c0_i32_1 = arith.constant 0 : i32
    return %arg0, %c0_i32, %arg1, %c0_i32_0 : i32, i32, i32, i32
  }
}

</mosaic_0001>

<bundles_post_ra>
// kernel: tpu_custom_call.1
= control target key start
LH: loop header
LB: loop body
LE: loop exit
PB: predicated region body
PF: predicated region fallthrough
CT: control target
= control target key end

     0   :  { %s2324_s0 = inlined_call_operand.vmem [shape: s32[24], index: 0, kind: input, shape index: {}]   ;;  %s2325_s1 = inlined_call_operand.hbm [shape: f32[2,3,64,128], index: 1, kind: input, shape index: {}]   ;;  %s2326_s2 = inlined_call_operand.vmem [shape: bf16[2,3,3,16,16], index: 2, kind: input, shape index: {}]   ;;  %s2327_s3 = inlined_call_operand.vmem [shape: s32[2,64,3], index: 3, kind: input, shape index: {}]   ;;  %s2328_s4 = inlined_call_operand.vmem [shape: s32[2,3,128], index: 4, kind: input, shape index: {}]   ;;  %s2329_s5 = inlined_call_operand.hbm [shape: f32[2,3,64,128], index: 5, kind: output, shape index: {}]  }
   0x1   :  { %2336 = sst [smem:[#allocation22_spill]] %s2325_s1  ;;  %s10_s20 = sshll.u32 %s2324_s0, 4  ;;  %s11_s20 = int_to_ptr.vmem [resolvable:$true] %s10_s20 }
   0x2   :  { %s1779_s21 = scalar_lea.vmem %s11_s20, 16  ;;  %p1784_p1 = scmp.lt.s32.totalorder %s11_s20, %s11_s20 }
   0x3   :  { %p1780_p0 = scmp.ne.s32.totalorder %s11_s20, %s1779_s21  ;;  %p1785_p2 = scmp.lt.s32.totalorder %s1779_s21, %s1779_s21 }
   0x5   :  { %p1786_p3 = por %p1785_p2, %p1784_p1 }
   0x7   :  { %p1787_p4 = pnand %p1786_p3, %p1780_p0 }
   0x9   :  { %1790 = shalt.err (!%p1787_p4)  }
   0xa   :  { %s1865_s22 = smov [#allocation3]  }
   0xb   :  { %13 = dma.vmem_to_smem %s11_s20, 16, %s1865_s22, [#allocation2] }
   0xc   :  { %1823 = dma.done.wait [#allocation2], 16 }
   0xd   :  { %1824 = vsyncadd [#allocation2], 4294967280 }
   0xe   :  { %15 = sfence }
   0xf   :  { %16 = vsyncpa [#allocation5], 0 }
  0x10   :  { %18 = vsyncpa [#allocation5 + $0x1], 0 }
  0x11   :  { %19 = vsyncpa [#allocation6], 0 }
  0x12   :  { %21 = vsyncpa [#allocation6 + $0x1], 0  ;;  %s1926_s23 = smov 0   ;;  %s1928_s0 = smov 0  }
  0x13   :  { %s1930_s24 = smov 0   ;;  %s1932_s25 = smov 0  }
  0x14   :  { %s1934_s26 = smov 0   ;;  %s1936_s27 = smov 0  }
  0x15   :  { %s1938_s28 = smov 0   ;;  %s1940_s29 = smov 0  }
  0x16 LB: > { %2337 = sst [smem:[#allocation16_spill]] %s1843_s24  ;;  %s1416_s30 = sadd.s32 4294967295, %s1863_s29   ;;  %s1863_s29 = sphi %s1940_s29, %s27_s29   ;;  %s1859_s28 = sphi %s1938_s28, %s2366_s28   ;;  %s1855_s27 = sphi %s1936_s27, %s2365_s27   ;;  %s1851_s26 = sphi %s1934_s26, %s2364_s26   ;;  %s1847_s25 = sphi %s1932_s25, %s2363_s25   ;;  %s1843_s24 = sphi %s1930_s24, %s2362_s24   ;;  %s1839_s0 = sphi %s1928_s0, %s2368_s0   ;;  %s1835_s23 = sphi %s1926_s23, %s2367_s23  }
  0x17   : > { %2338 = sst [smem:[#allocation17_spill]] %s1855_s27  ;;  %s1417_s6 = sadd.s32 4294967294, %s1863_s29  }
  0x18   : > { %2339 = sst [smem:[#allocation18_spill]] %s1859_s28  ;;  %s36_s7 = sadd.s32 1, %s1855_s27 }
  0x19   : > { %p37_p5 = scmp.ge.s32.totalorder %s36_s7, 4  ;;  %s39_s8 = sadd.s32 1, %s1859_s28 }
  0x1a   : > { %p55_p6 = scmp.ne.s32.totalorder %s1843_s24, %s1839_s0  ;;  %p56_p7 = scmp.eq.s32.totalorder %s1863_s29, 0 }
  0x1b   : > { %s2370_s7 = smov (%p37_p5, %s36_s7), 0  ;;  %s2372_s8 = smov (!%p37_p5, %s39_s8), %s1859_s28 }
  0x1c   : > { %2340 = sst [smem:[#allocation19_spill]] %s2370_s7  ;;  %s44_s9 = ssub.s32 %s1855_s27, %s2370_s7 }
  0x1d   : > { %p1978_p8 = por %p56_p7, %p55_p6  ;;  %p41_p9 = scmp.ge.s32.totalorder %s2372_s8, 2 }
  0x1e   : > { %p61_p10 = scmp.ne.s32.totalorder %s1839_s0, %s1835_s23  ;;  %p62_p11 = scmp.eq.s32.totalorder %s1416_s30, 0 }
  0x1f   : > { %p167_p12 = scmp.eq.s32.totalorder %s1416_s30, 7  ;;  %s2374_s8 = smov (%p41_p9, %s2372_s8), 0 }
  0x20   : > { %2342 = sst [smem:[#allocation20_spill]] %s2374_s8  ;;  %p1986_p13 = por %p62_p11, %p61_p10 }
  0x21   : > { %p1990_p0 = por %p167_p12, %p55_p6  ;;  %s43_s13 = ssub.s32 %s1859_s28, %s2374_s8 }
  0x22   : > { %p173_p1 = scmp.eq.s32.totalorder %s1417_s6, 7  ;;  %s45_s14 = sor.u32 %s44_s9, %s43_s13 }
  0x23   : > { %s48_s15 = sadd.s32 1, %s1843_s24  ;;  %p46_p2 = scmp.eq.s32.totalorder %s45_s14, 0 }
  0x24   : > { %p1997_p3 = por %p173_p1, %p61_p10  ;;  %p1419_p4 = scmp.ge.s32.totalorder %s1863_s29, 8 }
  0x25   : > { %s2002_s17 = scalar_select %p46_p2, %s1843_s24, %s48_s15  }
  0x26   : > { %189 = sbr.rel (%p1419_p4) target bundleno = 63 (0x3f), region = 16 }
  0x27   : > { %2346 = sst [smem:[#allocation21_spill]] %s2002_s17 }
  0x2d   : > { %s193_s18 = sand.u32 1, %s1843_s24   ;;  %s1420_s20 = sshll.u32 %s1855_s27, 1 }
  0x2e   : > { %s1645_s19 = smul.u32 48, %s193_s18  ;;  %s1866_s22 = smov 1024  }
  0x2f   : > { %s1646_s21 = smul.u32 24, %s1859_s28  ;;  %1651 = sst [smem:[#allocation9]] (%p1978_p8), %s1866_s22 }
  0x30   : > { %s197_s6 = scalar_lea.vmem [#allocation4], %s1645_s19  ;;  %s1867_s14 = smov 256  }
  0x31   : > { %s203_s30 = sadd.s32 %s1646_s21, %s1420_s20  ;;  %s218_s9 = sshll.u32 %s197_s6, 4  ;;  %s219_s9 = int_to_ptr.vmem [resolvable:$true] %s218_s9 }
  0x32   : > { %s1650_s13 = scalar_select %p1978_p8, [#allocation0], [#allocation12] }
  0x33   : > { %1652 = sst [smem:[#allocation9 + $0x1]] (%p1978_p8), %s1867_s14  ;;  %s1868_s8 = smov 2  }
  0x34   : > { %s210_s15 = sld [smem:[%s1650_s13]]   ;;  %s1421_s7 = sshll.u32 %s203_s30, 7 }
  0x35   : > { %1653 = sst [smem:[#allocation9 + $0x2]] (%p1978_p8), %s1868_s8  ;;  %s1869_s27 = smov 128  }
  0x36   : > { %1654 = sst [smem:[#allocation9 + $0x3]] (%p1978_p8), %s1869_s27  ;;  %s1870_s20 = smov 8  }
  0x37   : > { %1655 = sst [smem:[#allocation9 + $0x4]] (%p1978_p8), %s1869_s27  ;;  %s2347_s1 = sld [smem:[#allocation22_spill]] }
  0x38   : > { %1656 = sst [smem:[#allocation9 + $0x5]] (%p1978_p8), %s1870_s20  ;;  %s194_s13 = scalar_lea.sflag [#allocation5], %s193_s18 }
  0x39   : > { %s1871_s28 = smov [#allocation8]  }
  0x3a   : > { %s1422_s6 = sshll.u32 %s210_s15, 26 }
  0x3b   : > { %s1423_s14 = sadd.s32 134217728, %s1422_s6 }
  0x3d   : > { %s205_s22 = scalar_lea.hbm %s2347_s1, %s1421_s7 }
  0x3e   : > { %1657 = dma.general (%p1978_p8), %s205_s22, 768, %s219_s9, %s194_s13, %s1871_s28, [#allocation9], %s1423_s14, 0  }
  0x3f PF: > { %p1424_p5 = scmp.ge.s32.totalorder %s1863_s29, 1  ;;  %p267_p6 = scmp.lt.s32.totalorder %s1863_s29, 9 }
  0x41   : > { %p268_p7 = pnand %p1424_p5, %p267_p6 }
  0x42   : > { %s2030_s27 = sand.u32 (!%p268_p7), 1, %s1839_s0  }
  0x43   : > { %271 = sbr.rel (%p268_p7) target bundleno = 1878 (0x756), region = 36  ;;  %s274_s8 = scalar_lea.sflag (!%p268_p7), [#allocation5], %s2030_s27 }
  0x44   : > { %s2334_s7 = smul.u32 (!%p268_p7), 48, %s2030_s27 }
  0x46   : > { %s2036_s18 = scalar_lea.vmem (!%p268_p7), [#allocation4], %s2334_s7 }
  0x4a   : > { %1826 = dma.done.wait (%p1986_p13), %s274_s8, 768  }
  0x4b   : > { %1828 = vsyncadd (%p1986_p13), %s274_s8, 4294966528  ;;  %p321_p8 = scmp.lt.s32.totalorder %s1851_s26, 1  ;;  %s2044_s28 = sshll.u32 %s1847_s25, 1  ;;  %v360_v0 = vlaneseq  ;;  %v345_v4 = vld [vmem:[%s2036_s18] sm:$0xff]  ;;  %v346_v5 = vld [vmem:[%s2036_s18 + $0x8] sm:$0xff] }
  0x4c   : > { %p329_p9 = scmp.lt.s32.totalorder %s2044_s28, 7  ;;  %s1430_s10 = sshll.u32 %s1851_s26, 2  ;;  %v347_v6 = vld [vmem:[%s2036_s18 + $0x10] sm:$0xff]  ;;  %v348_v10 = vld [vmem:[%s2036_s18 + $0x18] sm:$0xff]  ;;  %v349_v11 = vld [vmem:[%s2036_s18 + $0x20] sm:$0xff] }
  0x4d   : > { %s322_s30 = scalar_select %p321_p8, %s1851_s26, 1  ;;  %v2049_v1 = vand.u32 127, %v360_v0  ;;  %v2051_v2 = vshrl.u32 %v360_v0, 7  ;;  %v350_v12 = vld [vmem:[%s2036_s18 + $0x28] sm:$0xff] }
  0x4e   : > { %s330_s11 = scalar_select %p329_p9, %s2044_s28, 7 }
  0x4f   : > { %s1648_s9 = smul.u32 72, %s322_s30  ;;  %s1427_s15 = sshll.u32 %s322_s30, 3  ;;  %v2055_v3 = vadd.s32 8, %v2051_v2 }
  0x50   : > { %s332_s20 = sadd.s32 %s1427_s15, %s330_s11  ;;  %s1429_s19 = sshll.u32 %s322_s30, 2 }
  0x51   : > { %s2060_s6 = scalar_lea.vmem %s2326_s2, %s1648_s9  ;;  %s1428_s14 = sshll.u32 %s332_s20, 3 }
  0x52   : > { %s334_s7 = scalar_lea.vmem %s2327_s3, %s1428_s14  ;;  %s339_s24 = scalar_lea.vmem %s2328_s4, %s1429_s19 }
  0x53   : > { %s343_s30 = sadd.s32 %s1847_s25, %s1430_s10  ;;  %v2072_v7 = vld [vmem:[%s334_s7] sm:$0xff]  ;;  %v2074_v8 = vld [vmem:[%s334_s7 + $0x8] sm:$0xff]  ;;  %s2348_s9 = smul.u32 48, %s2030_s27 }
  0x54   : > { %v2076_v9 = vld [vmem:[%s339_s24] sm:$0x7]  ;;  %s2078_s11 = smul.u32 3, %s343_s30 }
  0x55   : > { %s2082_s15 = scalar_lea.vmem [#allocation7], %s2348_s9 }
  0x56   : > { %351 = vst [vmem:[%s2082_s15] sm:$0xff] %v345_v4  ;;  %352 = vst [vmem:[%s2082_s15 + $0x8] sm:$0xff] %v346_v5  ;;  %s365_s1 = sld [smem:[#allocation3 + %s2078_s11]] }
  0x57   : > { %353 = vst [vmem:[%s2082_s15 + $0x10] sm:$0xff] %v347_v6  ;;  %354 = vst [vmem:[%s2082_s15 + $0x18] sm:$0xff] %v348_v10 }
  0x58   : > { %355 = vst [vmem:[%s2082_s15 + $0x20] sm:$0xff] %v349_v11  ;;  %356 = vst [vmem:[%s2082_s15 + $0x28] sm:$0xff] %v350_v12 }
  0x5c   : > { %p1431_p10 = scmp.eq.s32.totalorder %s365_s1, 0 }
  0x5d   : > { %v1872_v13 = vmov (!%p1431_p10), 0   ;;  %v1873_v14 = vmov (!%p1431_p10), 0.0   ;;  %v1766_v15 = vld [vmem:[%s2060_s6] sm:$0xff] (!%p1431_p10)   ;;  %vm1874_vm0 = vmmov (!%p1431_p10), 0   ;;  %vm406_vm3 = vcmask (!%p1431_p10), 130048   ;;  %v1767_v20 = vld [vmem:[%s2060_s6 + $0x8] sm:$0xff] (!%p1431_p10)  }
  0x5e   : > { %369 = sbr.rel (%p1431_p10) target bundleno = 679 (0x2a7), region = 44  ;;  %1764 = vset.pattern.permute.xlu0 (!%p1431_p10), %v1872_v13  ;;  %1549 = vmatprep.subr.bf16.mxu0 (!%p1431_p10), %v1873_v14  ;;  %v1768_v22 = vld [vmem:[%s2060_s6 + $0x10] sm:$0xff] (!%p1431_p10)   ;;  %v385_v23 = vsub.s32 (!%p1431_p10), 0, %v2051_v2  ;;  %v1875_v25 = vmov (!%p1431_p10), 1.0|1.0   ;;  %vm614_vm7 = vcmp.ne.s32.totalorder (!%p1431_p10), %v2072_v7, 16 }
  0x5f   : > { %371 = vperm.xlu0 (!%p1431_p10), %1764, %v2072_v7   ;;  %1567 = vmatprep.subr.bf16.mxu1 (!%p1431_p10), %v1873_v14  ;;  %vm615_vm8 = vcmp.ne.s32.totalorder (!%p1431_p10), %v2074_v8, 16  ;;  %v617_v26 = vsel (!%p1431_p10), %vm614_vm7, 1, %v1872_v13  ;;  %vm616_vm9 = vcmp.ne.s32.totalorder (!%p1431_p10), %v2076_v9, 16  ;;  %v635_v48 = vld [vmem:[%s2082_s15] sm:$0xff] (!%p1431_p10)  ;;  %v636_v51 = vld [vmem:[%s2082_s15 + $0x8] sm:$0xff] (!%p1431_p10)  ;;  %v1447_v57 = vld [vmem:[%s2082_s15 + $0x10] sm:$0xff] (!%p1431_p10) }
  0x60   : > { %1765 = vset.pattern.permute.xlu1 (!%p1431_p10), %v1872_v13  ;;  %1550 = vmatpush3.bf16.msra.mxu0 (!%p1431_p10), %v1766_v15  ;;  %v386_v24 = vrot.slane (!%p1431_p10), %v2076_v9, %v385_v23  ;;  %v618_v27 = vsel (!%p1431_p10), %vm615_vm8, 1, %v1872_v13  ;;  %v627_v43 = vsel (!%p1431_p10), %vm616_vm9, 1, %v1872_v13  ;;  %v1448_v59 = vld [vmem:[%s2082_s15 + $0x18] sm:$0xff] (!%p1431_p10)  ;;  %v1451_v4 = vld [vmem:[%s2082_s15 + $0x20] sm:$0xff] (!%p1431_p10)  ;;  %v1452_v6 = vld [vmem:[%s2082_s15 + $0x28] sm:$0xff] (!%p1431_p10) }
  0x61   : > { %1555 = vmatprep.subr.bf16.mxu0 (!%p1431_p10), %v1873_v14  ;;  %1551 = vmatprep.mubr.msk.bf16.mxu0 (!%p1431_p10), %vm1874_vm0, %v1873_v14  ;;  %v631_v45 = vrot.slane (!%p1431_p10), %v627_v43, %v385_v23 }
  0x62   : > { %1569 = vmatprep.mubr.msk.bf16.mxu1 (!%p1431_p10), %vm1874_vm0, %v1873_v14  ;;  %vm387_vm4 = vcmp.eq.s32.totalorder (!%p1431_p10), %v386_v24, %v2051_v2  ;;  %vm388_vm5 = vcmp.eq.s32.totalorder (!%p1431_p10), %v386_v24, %v2055_v3  ;;  %620 = vperm.xlu1 (!%p1431_p10), %1765, %v617_v26  }
  0x63   : > { %374 = vperm.xlu0 (!%p1431_p10), %1764, %v2074_v8   ;;  %vm1442_vm6 = vmpackc.low (!%p1431_p10), %vm388_vm5, %vm387_vm4  ;;  %vm632_vm10 = vcmp.eq.s32.totalorder (!%p1431_p10), %v631_v45, 1 }
  0x64   : > { %1568 = vmatpush3.bf16.msk.msra.mxu1 (!%p1431_p10), %vm1442_vm6, %v1875_v25 }
  0x66   : > { %623 = vperm.xlu1 %1765, %v618_v27  }
  0xde   : > { %v372_v16 = vpop.permute.xlu0 %371 }
  0xdf   : > { %vm376_vm1 = vcmp.eq.s32.totalorder %v372_v16, %v2049_v1 }
  0xe0   : > { %v1432_v18 = vsel %vm376_vm1, 1.0, %v1873_v14 }
  0xe1   : > { %v621_v44 = vpop.permute.xlu1 %620 }
  0xe2   : > { %v375_v17 = vpop.permute.xlu0 %374  ;;  %vm625_vm11 = vcmp.eq.s32.totalorder %v621_v44, 1 }
  0xe3   : > { %vm377_vm2 = vcmp.eq.s32.totalorder %v375_v17, %v2049_v1  ;;  %vm2125_vm13 = vmand %vm625_vm11, %vm632_vm10 }
  0xe4   : > { %v1433_v19 = vsel %vm377_vm2, 1.0, %v1873_v14 }
  0xe5   : > { %v382_v21 = vpack.c.bf16 %v1433_v19, %v1432_v18  ;;  %v624_v46 = vpop.permute.xlu1 %623 }
  0xe6   : > { %vm626_vm12 = vcmp.eq.s32.totalorder %v624_v46, 1 }
  0xe7   : > { %1552 = vmatmul.mubr.msk.bf16.vlgmr.msra.gmra.mrb[0].mxu0 %vm406_vm3, %v382_v21  ;;  %vm2130_vm14 = vmand %vm626_vm12, %vm632_vm10 }
  0xe8   : > { %1556 = vmatpush3.bf16.msra.mxu0 %v1767_v20  ;;  %1557 = vmatprep.mubr.msk.bf16.mxu0 %vm1874_vm0, %v1873_v14 }
  0xe9   : > { %1561 = vmatprep.subr.bf16.mxu0 %v1873_v14 }
  0xef   : > { %1558 = vmatmul.mubr.msk.bf16.vlgmr.msra.gmra.mrb[4].mxu0 %vm406_vm3, %v382_v21 }
  0xf0   : > { %1562 = vmatpush3.bf16.msra.mxu0 %v1768_v22  ;;  %1563 = vmatprep.mubr.msk.bf16.mxu0 %vm1874_vm0, %v1873_v14 }
  0xf7   : > { %1564 = vmatmul.mubr.msk.bf16.vlgmr.msra.gmra.mrb[8].mxu0 %vm406_vm3, %v382_v21 }
 0x1ba   : > { %v444_v28 = vpop.f32.mrb[0].mxu0 }
 0x1bb   : > { %v1553_v29 = vpop.f32.mrb[1].mxu0 }
 0x1bc   : > { %v447_v30 = vpop.f32.mrb[2].mxu0 }
 0x1bd   : > { %v545_v31 = vpack.c.bf16 %v447_v30, %v444_v28  ;;  %v1554_v32 = vpop.f32.mrb[3].mxu0 }
 0x1bf   : > { %1570 = vmatmul.mubr.msk.bf16.vlgmr.msra.gmra.mrb[0].mxu1 %vm406_vm3, %v545_v31 }
 0x1c0   : > { %1573 = vmatprep.mubr.msk.bf16.mxu1 %vm1874_vm0, %v1873_v14 }
 0x1c2   : > { %v491_v33 = vpop.f32.mrb[4].mxu0 }
 0x1c3   : > { %v1559_v34 = vpop.f32.mrb[5].mxu0 }
 0x1c4   : > { %v494_v35 = vpop.f32.mrb[6].mxu0 }
 0x1c5   : > { %v546_v36 = vpack.c.bf16 %v494_v35, %v491_v33  ;;  %v1560_v37 = vpop.f32.mrb[7].mxu0 }
 0x1c7   : > { %1574 = vmatmul.mubr.msk.bf16.gmra.mrb[4].mxu1 %vm406_vm3, %v546_v36 }
 0x1c8   : > { %1577 = vmatprep.mubr.msk.bf16.mxu1 %vm1874_vm0, %v1873_v14 }
 0x1ca   : > { %v538_v38 = vpop.f32.mrb[8].mxu0 }
 0x1cb   : > { %v1565_v39 = vpop.f32.mrb[9].mxu0 }
 0x1cc   : > { %v541_v40 = vpop.f32.mrb[10].mxu0 }
 0x1cd   : > { %v547_v41 = vpack.c.bf16 %v541_v40, %v538_v38  ;;  %v1566_v42 = vpop.f32.mrb[11].mxu0 }
 0x1cf   : > { %1578 = vmatmul.mubr.msk.bf16.gmra.mrb[8].mxu1 %vm406_vm3, %v547_v41 }
 0x292   : > { %v591_v49 = vpop.f32.mrb[0].mxu1 }
 0x293   : > { %v637_v52 = vsel %vm2125_vm13, %v591_v49, %v635_v48  ;;  %v1571_v53 = vpop.f32.mrb[1].mxu1 }
 0x294   : > { %639 = vst [vmem:[%s2082_s15] sm:$0xff] %v637_v52  ;;  %v594_v54 = vpop.f32.mrb[2].mxu1 }
 0x295   : > { %v638_v55 = vsel %vm2130_vm14, %v594_v54, %v636_v51  ;;  %v1572_v56 = vpop.f32.mrb[3].mxu1 }
 0x296   : > { %640 = vst [vmem:[%s2082_s15 + $0x8] sm:$0xff] %v638_v55 }
 0x29a   : > { %v599_v58 = vpop.f32.mrb[4].mxu1 }
 0x29b   : > { %v644_v60 = vsel %vm2125_vm13, %v599_v58, %v1447_v57  ;;  %v1575_v61 = vpop.f32.mrb[5].mxu1 }
 0x29c   : > { %1449 = vst [vmem:[%s2082_s15 + $0x10] sm:$0xff] %v644_v60  ;;  %v602_v62 = vpop.f32.mrb[6].mxu1 }
 0x29d   : > { %v645_v63 = vsel %vm2130_vm14, %v602_v62, %v1448_v59  ;;  %v1576_v0 = vpop.f32.mrb[7].mxu1 }
 0x29e   : > { %1450 = vst [vmem:[%s2082_s15 + $0x18] sm:$0xff] %v645_v63 }
 0x2a2   : > { %v607_v5 = vpop.f32.mrb[8].mxu1 }
 0x2a3   : > { %v651_v10 = vsel %vm2125_vm13, %v607_v5, %v1451_v4  ;;  %v1579_v11 = vpop.f32.mrb[9].mxu1 }
 0x2a4   : > { %1453 = vst [vmem:[%s2082_s15 + $0x20] sm:$0xff] %v651_v10  ;;  %v610_v12 = vpop.f32.mrb[10].mxu1 }
 0x2a5   : > { %v652_v13 = vsel %vm2130_vm14, %v610_v12, %v1452_v6  ;;  %v1580_v14 = vpop.f32.mrb[11].mxu1 }
 0x2a6   : > { %1454 = vst [vmem:[%s2082_s15 + $0x28] sm:$0xff] %v652_v13 }
 0x2a7 PF: > { %s655_s24 = sadd.s32 1, %s2078_s11 }
 0x2a8   : > { %s656_s25 = sld [smem:[#allocation3 + %s655_s24]] }
 0x2ae   : > { %p1455_p11 = scmp.eq.s32.totalorder %s656_s25, 0 }
 0x2af   : > { %v1876_v15 = vmov (!%p1455_p11), 1   ;;  %v1877_v16 = vmov (!%p1455_p11), 0.0   ;;  %v1771_v17 = vld [vmem:[%s2060_s6 + $0x18] sm:$0xff] (!%p1455_p11)   ;;  %vm1878_vm15 = vmmov (!%p1455_p11), 0   ;;  %vm698_vm2 = vcmask (!%p1455_p11), 130048   ;;  %v1772_v22 = vld [vmem:[%s2060_s6 + $0x20] sm:$0xff] (!%p1455_p11)  }
 0x2b0   : > { %660 = sbr.rel (%p1455_p11) target bundleno = 1273 (0x4f9), region = 48  ;;  %1769 = vset.pattern.permute.xlu0 (!%p1455_p11), %v1876_v15  ;;  %1581 = vmatprep.subr.bf16.mxu0 (!%p1455_p11), %v1877_v16  ;;  %v1773_v24 = vld [vmem:[%s2060_s6 + $0x28] sm:$0xff] (!%p1455_p11)   ;;  %v676_v25 = vsub.s32 (!%p1455_p11), 1, %v2051_v2  ;;  %v1879_v27 = vmov (!%p1455_p11), 1.0|1.0   ;;  %vm906_vm6 = vcmp.ne.s32.totalorder (!%p1455_p11), %v2072_v7, 16 }
 0x2b1   : > { %662 = vperm.xlu0 (!%p1455_p11), %1769, %v2072_v7   ;;  %1599 = vmatprep.subr.bf16.mxu1 (!%p1455_p11), %v1877_v16  ;;  %vm907_vm7 = vcmp.ne.s32.totalorder (!%p1455_p11), %v2074_v8, 16  ;;  %vm908_vm8 = vcmp.ne.s32.totalorder (!%p1455_p11), %v2076_v9, 16  ;;  %v1880_v28 = vmov (!%p1455_p11), 0   ;;  %v927_v51 = vld [vmem:[%s2082_s15] sm:$0xff] (!%p1455_p11)  ;;  %v928_v54 = vld [vmem:[%s2082_s15 + $0x8] sm:$0xff] (!%p1455_p11)  ;;  %v1477_v60 = vld [vmem:[%s2082_s15 + $0x10] sm:$0xff] (!%p1455_p11) }
 0x2b2   : > { %1770 = vset.pattern.permute.xlu1 (!%p1455_p11), %v1876_v15  ;;  %1582 = vmatpush3.bf16.msra.mxu0 (!%p1455_p11), %v1771_v17  ;;  %v677_v26 = vrot.slane (!%p1455_p11), %v2076_v9, %v676_v25  ;;  %v909_v29 = vsel (!%p1455_p11), %vm906_vm6, 1, %v1880_v28  ;;  %v919_v30 = vsel (!%p1455_p11), %vm908_vm8, 1, %v1880_v28  ;;  %v910_v32 = vsel (!%p1455_p11), %vm907_vm7, 1, %v1880_v28  ;;  %v1478_v62 = vld [vmem:[%s2082_s15 + $0x18] sm:$0xff] (!%p1455_p11)  ;;  %v1481_v10 = vld [vmem:[%s2082_s15 + $0x20] sm:$0xff] (!%p1455_p11)  ;;  %v1482_v12 = vld [vmem:[%s2082_s15 + $0x28] sm:$0xff] (!%p1455_p11) }
 0x2b3   : > { %1587 = vmatprep.subr.bf16.mxu0 (!%p1455_p11), %v1877_v16  ;;  %1583 = vmatprep.mubr.msk.bf16.mxu0 (!%p1455_p11), %vm1878_vm15, %v1877_v16  ;;  %v923_v31 = vrot.slane (!%p1455_p11), %v919_v30, %v676_v25 }
 0x2b4   : > { %1601 = vmatprep.mubr.msk.bf16.mxu1 (!%p1455_p11), %vm1878_vm15, %v1877_v16  ;;  %vm678_vm3 = vcmp.eq.s32.totalorder (!%p1455_p11), %v677_v26, %v2051_v2  ;;  %vm679_vm4 = vcmp.eq.s32.totalorder (!%p1455_p11), %v677_v26, %v2055_v3  ;;  %912 = vperm.xlu1 (!%p1455_p11), %1770, %v909_v29  }
 0x2b5   : > { %665 = vperm.xlu0 (!%p1455_p11), %1769, %v2074_v8   ;;  %vm1472_vm5 = vmpackc.low (!%p1455_p11), %vm679_vm4, %vm678_vm3  ;;  %vm924_vm9 = vcmp.eq.s32.totalorder (!%p1455_p11), %v923_v31, 1 }
 0x2b6   : > { %1600 = vmatpush3.bf16.msk.msra.mxu1 (!%p1455_p11), %vm1472_vm5, %v1879_v27 }
 0x2b8   : > { %915 = vperm.xlu1 %1770, %v910_v32  }
 0x330   : > { %v663_v18 = vpop.permute.xlu0 %662 }
 0x331   : > { %vm667_vm0 = vcmp.eq.s32.totalorder %v663_v18, %v2049_v1 }
 0x332   : > { %v1456_v20 = vsel %vm667_vm0, 1.0, %v1877_v16 }
 0x333   : > { %v913_v48 = vpop.permute.xlu1 %912 }
 0x334   : > { %v666_v19 = vpop.permute.xlu0 %665  ;;  %vm917_vm10 = vcmp.eq.s32.totalorder %v913_v48, 1 }
 0x335   : > { %vm668_vm1 = vcmp.eq.s32.totalorder %v666_v19, %v2049_v1  ;;  %vm2184_vm12 = vmand %vm917_vm10, %vm924_vm9 }
 0x336   : > { %v1457_v21 = vsel %vm668_vm1, 1.0, %v1877_v16 }
 0x337   : > { %v673_v23 = vpack.c.bf16 %v1457_v21, %v1456_v20  ;;  %v916_v49 = vpop.permute.xlu1 %915 }
 0x338   : > { %vm918_vm11 = vcmp.eq.s32.totalorder %v916_v49, 1 }
 0x339   : > { %1584 = vmatmul.mubr.msk.bf16.vlgmr.msra.gmra.mrb[0].mxu0 %vm698_vm2, %v673_v23  ;;  %vm2189_vm13 = vmand %vm918_vm11, %vm924_vm9 }
 0x33a   : > { %1588 = vmatpush3.bf16.msra.mxu0 %v1772_v22  ;;  %1589 = vmatprep.mubr.msk.bf16.mxu0 %vm1878_vm15, %v1877_v16 }
 0x33b   : > { %1593 = vmatprep.subr.bf16.mxu0 %v1877_v16 }
 0x341   : > { %1590 = vmatmul.mubr.msk.bf16.vlgmr.msra.gmra.mrb[4].mxu0 %vm698_vm2, %v673_v23 }
 0x342   : > { %1594 = vmatpush3.bf16.msra.mxu0 %v1773_v24  ;;  %1595 = vmatprep.mubr.msk.bf16.mxu0 %vm1878_vm15, %v1877_v16 }
 0x349   : > { %1596 = vmatmul.mubr.msk.bf16.vlgmr.msra.gmra.mrb[8].mxu0 %vm698_vm2, %v673_v23 }
 0x40c   : > { %v736_v33 = vpop.f32.mrb[0].mxu0 }
 0x40d   : > { %v1585_v34 = vpop.f32.mrb[1].mxu0 }
 0x40e   : > { %v739_v35 = vpop.f32.mrb[2].mxu0 }
 0x40f   : > { %v837_v36 = vpack.c.bf16 %v739_v35, %v736_v33  ;;  %v1586_v37 = vpop.f32.mrb[3].mxu0 }
 0x411   : > { %1602 = vmatmul.mubr.msk.bf16.vlgmr.msra.gmra.mrb[0].mxu1 %vm698_vm2, %v837_v36 }
 0x412   : > { %1605 = vmatprep.mubr.msk.bf16.mxu1 %vm1878_vm15, %v1877_v16 }
 0x414   : > { %v783_v38 = vpop.f32.mrb[4].mxu0 }
 0x415   : > { %v1591_v39 = vpop.f32.mrb[5].mxu0 }
 0x416   : > { %v786_v40 = vpop.f32.mrb[6].mxu0 }
 0x417   : > { %v838_v41 = vpack.c.bf16 %v786_v40, %v783_v38  ;;  %v1592_v42 = vpop.f32.mrb[7].mxu0 }
 0x419   : > { %1606 = vmatmul.mubr.msk.bf16.gmra.mrb[4].mxu1 %vm698_vm2, %v838_v41 }
 0x41a   : > { %1609 = vmatprep.mubr.msk.bf16.mxu1 %vm1878_vm15, %v1877_v16 }
 0x41c   : > { %v830_v43 = vpop.f32.mrb[8].mxu0 }
 0x41d   : > { %v1597_v44 = vpop.f32.mrb[9].mxu0 }
 0x41e   : > { %v833_v45 = vpop.f32.mrb[10].mxu0 }
 0x41f   : > { %v839_v46 = vpack.c.bf16 %v833_v45, %v830_v43  ;;  %v1598_v47 = vpop.f32.mrb[11].mxu0 }
 0x421   : > { %1610 = vmatmul.mubr.msk.bf16.gmra.mrb[8].mxu1 %vm698_vm2, %v839_v46 }
 0x4e4   : > { %v883_v53 = vpop.f32.mrb[0].mxu1 }
 0x4e5   : > { %v929_v55 = vsel %vm2184_vm12, %v883_v53, %v927_v51  ;;  %v1603_v56 = vpop.f32.mrb[1].mxu1 }
 0x4e6   : > { %931 = vst [vmem:[%s2082_s15] sm:$0xff] %v929_v55  ;;  %v886_v57 = vpop.f32.mrb[2].mxu1 }
 0x4e7   : > { %v930_v58 = vsel %vm2189_vm13, %v886_v57, %v928_v54  ;;  %v1604_v59 = vpop.f32.mrb[3].mxu1 }
 0x4e8   : > { %932 = vst [vmem:[%s2082_s15 + $0x8] sm:$0xff] %v930_v58 }
 0x4ec   : > { %v891_v61 = vpop.f32.mrb[4].mxu1 }
 0x4ed   : > { %v936_v63 = vsel %vm2184_vm12, %v891_v61, %v1477_v60  ;;  %v1607_v0 = vpop.f32.mrb[5].mxu1 }
 0x4ee   : > { %1479 = vst [vmem:[%s2082_s15 + $0x10] sm:$0xff] %v936_v63  ;;  %v894_v4 = vpop.f32.mrb[6].mxu1 }
 0x4ef   : > { %v937_v5 = vsel %vm2189_vm13, %v894_v4, %v1478_v62  ;;  %v1608_v6 = vpop.f32.mrb[7].mxu1 }
 0x4f0   : > { %1480 = vst [vmem:[%s2082_s15 + $0x18] sm:$0xff] %v937_v5 }
 0x4f4   : > { %v899_v11 = vpop.f32.mrb[8].mxu1 }
 0x4f5   : > { %v943_v13 = vsel %vm2184_vm12, %v899_v11, %v1481_v10  ;;  %v1611_v14 = vpop.f32.mrb[9].mxu1 }
 0x4f6   : > { %1483 = vst [vmem:[%s2082_s15 + $0x20] sm:$0xff] %v943_v13  ;;  %v902_v15 = vpop.f32.mrb[10].mxu1 }
 0x4f7   : > { %v944_v16 = vsel %vm2189_vm13, %v902_v15, %v1482_v12  ;;  %v1612_v17 = vpop.f32.mrb[11].mxu1 }
 0x4f8   : > { %1484 = vst [vmem:[%s2082_s15 + $0x28] sm:$0xff] %v944_v16 }
 0x4f9 PF: > { %s947_s17 = sadd.s32 2, %s2078_s11 }
 0x4fa   : > { %s948_s7 = sld [smem:[#allocation3 + %s947_s17]] }
 0x500   : > { %p1485_p12 = scmp.eq.s32.totalorder %s948_s7, 0 }
 0x501   : > { %v1881_v18 = vmov (!%p1485_p12), 2   ;;  %v1882_v19 = vmov (!%p1485_p12), 0.0   ;;  %v1776_v20 = vld [vmem:[%s2060_s6 + $0x30] sm:$0xff] (!%p1485_p12)   ;;  %vm1883_vm14 = vmmov (!%p1485_p12), 0   ;;  %vm990_vm1 = vcmask (!%p1485_p12), 130048   ;;  %v1777_v25 = vld [vmem:[%s2060_s6 + $0x38] sm:$0xff] (!%p1485_p12)  }
 0x502   : > { %952 = sbr.rel (%p1485_p12) target bundleno = 1867 (0x74b), region = 52  ;;  %1774 = vset.pattern.permute.xlu0 (!%p1485_p12), %v1881_v18  ;;  %1613 = vmatprep.subr.bf16.mxu0 (!%p1485_p12), %v1882_v19  ;;  %v1778_v27 = vld [vmem:[%s2060_s6 + $0x40] sm:$0xff] (!%p1485_p12)   ;;  %v1884_v29 = vmov (!%p1485_p12), 1.0|1.0   ;;  %vm1198_vm5 = vcmp.ne.s32.totalorder (!%p1485_p12), %v2072_v7, 16  ;;  %vm1199_vm6 = vcmp.ne.s32.totalorder (!%p1485_p12), %v2074_v8, 16 }
 0x503   : > { %954 = vperm.xlu0 (!%p1485_p12), %1774, %v2072_v7   ;;  %1631 = vmatprep.subr.bf16.mxu1 (!%p1485_p12), %v1882_v19  ;;  %vm1200_vm7 = vcmp.ne.s32.totalorder (!%p1485_p12), %v2076_v9, 16  ;;  %v1885_v30 = vmov (!%p1485_p12), 0   ;;  %v1219_v48 = vld [vmem:[%s2082_s15] sm:$0xff] (!%p1485_p12)  ;;  %v1220_v51 = vld [vmem:[%s2082_s15 + $0x8] sm:$0xff] (!%p1485_p12)  ;;  %v1507_v57 = vld [vmem:[%s2082_s15 + $0x10] sm:$0xff] (!%p1485_p12) }
 0x504   : > { %1775 = vset.pattern.permute.xlu1 (!%p1485_p12), %v1881_v18  ;;  %1614 = vmatpush3.bf16.msra.mxu0 (!%p1485_p12), %v1776_v20  ;;  %v1201_v31 = vsel (!%p1485_p12), %vm1198_vm5, 1, %v1885_v30  ;;  %v1211_v32 = vsel (!%p1485_p12), %vm1200_vm7, 1, %v1885_v30  ;;  %v1202_v34 = vsel (!%p1485_p12), %vm1199_vm6, 1, %v1885_v30  ;;  %v1508_v59 = vld [vmem:[%s2082_s15 + $0x18] sm:$0xff] (!%p1485_p12)  ;;  %v1511_v4 = vld [vmem:[%s2082_s15 + $0x20] sm:$0xff] (!%p1485_p12)  ;;  %v1512_v6 = vld [vmem:[%s2082_s15 + $0x28] sm:$0xff] (!%p1485_p12) }
 0x505   : > { %1619 = vmatprep.subr.bf16.mxu0 (!%p1485_p12), %v1882_v19  ;;  %1615 = vmatprep.mubr.msk.bf16.mxu0 (!%p1485_p12), %vm1883_vm14, %v1882_v19 }
 0x506   : > { %1633 = vmatprep.mubr.msk.bf16.mxu1 (!%p1485_p12), %vm1883_vm14, %v1882_v19  ;;  %1204 = vperm.xlu1 (!%p1485_p12), %1775, %v1201_v31  }
 0x507   : > { %957 = vperm.xlu0 (!%p1485_p12), %1774, %v2074_v8  }
 0x50a   : > { %1207 = vperm.xlu1 %1775, %v1202_v34  }
 0x582   : > { %v955_v21 = vpop.permute.xlu0 %954 }
 0x583   : > { %vm959_vm15 = vcmp.eq.s32.totalorder %v955_v21, %v2049_v1 }
 0x584   : > { %v1486_v23 = vsel %vm959_vm15, 1.0, %v1882_v19 }
 0x585   : > { %v1205_v45 = vpop.permute.xlu1 %1204 }
 0x586   : > { %v958_v22 = vpop.permute.xlu0 %957  ;;  %vm1209_vm9 = vcmp.eq.s32.totalorder %v1205_v45, 1 }
 0x587   : > { %vm960_vm0 = vcmp.eq.s32.totalorder %v958_v22, %v2049_v1  ;;  %v968_v1 = vsub.s32 2, %v2051_v2 }
 0x588   : > { %v1487_v24 = vsel %vm960_vm0, 1.0, %v1882_v19 }
 0x589   : > { %v965_v26 = vpack.c.bf16 %v1487_v24, %v1486_v23  ;;  %v969_v28 = vrot.slane %v2076_v9, %v968_v1  ;;  %v1215_v33 = vrot.slane %v1211_v32, %v968_v1  ;;  %v1208_v46 = vpop.permute.xlu1 %1207 }
 0x58a   : > { %vm1210_vm10 = vcmp.eq.s32.totalorder %v1208_v46, 1 }
 0x58b   : > { %1616 = vmatmul.mubr.msk.bf16.vlgmr.msra.gmra.mrb[0].mxu0 %vm990_vm1, %v965_v26  ;;  %vm970_vm2 = vcmp.eq.s32.totalorder %v969_v28, %v2051_v2  ;;  %vm971_vm3 = vcmp.eq.s32.totalorder %v969_v28, %v2055_v3  ;;  %vm1216_vm8 = vcmp.eq.s32.totalorder %v1215_v33, 1 }
 0x58c   : > { %1620 = vmatpush3.bf16.msra.mxu0 %v1777_v25  ;;  %1621 = vmatprep.mubr.msk.bf16.mxu0 %vm1883_vm14, %v1882_v19  ;;  %vm1502_vm4 = vmpackc.low %vm971_vm3, %vm970_vm2 }
 0x58d   : > { %1625 = vmatprep.subr.bf16.mxu0 %v1882_v19  ;;  %1632 = vmatpush3.bf16.msk.msra.mxu1 %vm1502_vm4, %v1884_v29  ;;  %vm2243_vm11 = vmand %vm1209_vm9, %vm1216_vm8 }
 0x58e   : > { %vm2248_vm12 = vmand %vm1210_vm10, %vm1216_vm8 }
 0x593   : > { %1622 = vmatmul.mubr.msk.bf16.vlgmr.msra.gmra.mrb[4].mxu0 %vm990_vm1, %v965_v26 }
 0x594   : > { %1626 = vmatpush3.bf16.msra.mxu0 %v1778_v27  ;;  %1627 = vmatprep.mubr.msk.bf16.mxu0 %vm1883_vm14, %v1882_v19 }
 0x59b   : > { %1628 = vmatmul.mubr.msk.bf16.vlgmr.msra.gmra.mrb[8].mxu0 %vm990_vm1, %v965_v26 }
 0x65e   : > { %v1028_v35 = vpop.f32.mrb[0].mxu0 }
 0x65f   : > { %v1617_v2 = vpop.f32.mrb[1].mxu0 }
 0x660   : > { %v1031_v36 = vpop.f32.mrb[2].mxu0 }
 0x661   : > { %v1129_v3 = vpack.c.bf16 %v1031_v36, %v1028_v35  ;;  %v1618_v37 = vpop.f32.mrb[3].mxu0 }
 0x663   : > { %1634 = vmatmul.mubr.msk.bf16.vlgmr.msra.gmra.mrb[0].mxu1 %vm990_vm1, %v1129_v3 }
 0x664   : > { %1637 = vmatprep.mubr.msk.bf16.mxu1 %vm1883_vm14, %v1882_v19 }
 0x666   : > { %v1075_v7 = vpop.f32.mrb[4].mxu0 }
 0x667   : > { %v1623_v8 = vpop.f32.mrb[5].mxu0 }
 0x668   : > { %v1078_v38 = vpop.f32.mrb[6].mxu0 }
 0x669   : > { %v1130_v9 = vpack.c.bf16 %v1078_v38, %v1075_v7  ;;  %v1624_v39 = vpop.f32.mrb[7].mxu0 }
 0x66b   : > { %1638 = vmatmul.mubr.msk.bf16.gmra.mrb[4].mxu1 %vm990_vm1, %v1130_v9 }
 0x66c   : > { %1641 = vmatprep.mubr.msk.bf16.mxu1 %vm1883_vm14, %v1882_v19 }
 0x66e   : > { %v1122_v40 = vpop.f32.mrb[8].mxu0 }
 0x66f   : > { %v1629_v41 = vpop.f32.mrb[9].mxu0 }
 0x670   : > { %v1125_v42 = vpop.f32.mrb[10].mxu0 }
 0x671   : > { %v1131_v43 = vpack.c.bf16 %v1125_v42, %v1122_v40  ;;  %v1630_v44 = vpop.f32.mrb[11].mxu0 }
 0x673   : > { %1642 = vmatmul.mubr.msk.bf16.gmra.mrb[8].mxu1 %vm990_vm1, %v1131_v43 }
 0x736   : > { %v1175_v50 = vpop.f32.mrb[0].mxu1 }
 0x737   : > { %v1221_v52 = vsel %vm2243_vm11, %v1175_v50, %v1219_v48  ;;  %v1635_v53 = vpop.f32.mrb[1].mxu1 }
 0x738   : > { %1223 = vst [vmem:[%s2082_s15] sm:$0xff] %v1221_v52  ;;  %v1178_v54 = vpop.f32.mrb[2].mxu1 }
 0x739   : > { %v1222_v55 = vsel %vm2248_vm12, %v1178_v54, %v1220_v51  ;;  %v1636_v56 = vpop.f32.mrb[3].mxu1 }
 0x73a   : > { %1224 = vst [vmem:[%s2082_s15 + $0x8] sm:$0xff] %v1222_v55 }
 0x73e   : > { %v1183_v58 = vpop.f32.mrb[4].mxu1 }
 0x73f   : > { %v1228_v60 = vsel %vm2243_vm11, %v1183_v58, %v1507_v57  ;;  %v1639_v61 = vpop.f32.mrb[5].mxu1 }
 0x740   : > { %1509 = vst [vmem:[%s2082_s15 + $0x10] sm:$0xff] %v1228_v60  ;;  %v1186_v62 = vpop.f32.mrb[6].mxu1 }
 0x741   : > { %v1229_v63 = vsel %vm2248_vm12, %v1186_v62, %v1508_v59  ;;  %v1640_v0 = vpop.f32.mrb[7].mxu1 }
 0x742   : > { %1510 = vst [vmem:[%s2082_s15 + $0x18] sm:$0xff] %v1229_v63 }
 0x746   : > { %v1191_v5 = vpop.f32.mrb[8].mxu1 }
 0x747   : > { %v1235_v10 = vsel %vm2243_vm11, %v1191_v5, %v1511_v4  ;;  %v1643_v11 = vpop.f32.mrb[9].mxu1 }
 0x748   : > { %1513 = vst [vmem:[%s2082_s15 + $0x20] sm:$0xff] %v1235_v10  ;;  %v1194_v12 = vpop.f32.mrb[10].mxu1 }
 0x749   : > { %v1236_v13 = vsel %vm2248_vm12, %v1194_v12, %v1512_v6  ;;  %v1644_v14 = vpop.f32.mrb[11].mxu1 }
 0x74a   : > { %1514 = vst [vmem:[%s2082_s15 + $0x28] sm:$0xff] %v1236_v13 }
 0x74b PF: > { %s1240_s18 = scalar_lea.sflag [#allocation6], %s2030_s27 }
 0x74c   : > { %s1649_s10 = smul.u32 24, %s1851_s26  ;;  %s1271_s20 = sshll.u32 %s2082_s15, 4  ;;  %s1272_s20 = int_to_ptr.vmem [resolvable:$true] %s1271_s20 }
 0x74d   : > { %s1886_s21 = smov 256   ;;  %s1887_s13 = smov 1024  }
 0x74e   : > { %s1252_s19 = sadd.s32 %s1649_s10, %s2044_s28  ;;  %1659 = sst [smem:[#allocation11]] (%p1990_p0), %s1886_s21 }
 0x74f   : > { %s1516_s22 = sshll.u32 %s1252_s19, 7  ;;  %1660 = sst [smem:[#allocation11 + $0x1]] (%p1990_p0), %s1887_s13 }
 0x750   : > { %s1254_s14 = scalar_lea.hbm %s2329_s5, %s1516_s22  ;;  %s1888_s8 = smov 2  }
 0x751   : > { %1661 = sst [smem:[#allocation11 + $0x2]] (%p1990_p0), %s1888_s8  ;;  %s1889_s26 = smov 128  }
 0x752   : > { %1662 = sst [smem:[#allocation11 + $0x3]] (%p1990_p0), %s1889_s26  ;;  %s1890_s28 = smov 8  }
 0x753   : > { %1663 = sst [smem:[#allocation11 + $0x4]] (%p1990_p0), %s1889_s26  ;;  %s1891_s30 = smov [#allocation10]  }
 0x754   : > { %1664 = sst [smem:[#allocation11 + $0x5]] (%p1990_p0), %s1890_s28  ;;  %s1892_s11 = smov 0  }
 0x755   : > { %1665 = dma.general (%p1990_p0), %s1272_s20, 768, %s1254_s14, %s1240_s18, %s1891_s30, [#allocation11], %s1892_s11, 0  }
 0x756 PF: > { %p1671_p13 = scmp.ge.s32.totalorder %s1863_s29, 2  ;;  %s1299_s9 = sand.u32 1, %s1835_s23  }
 0x757   : > { %s1300_s15 = scalar_lea.sflag [#allocation6], %s1299_s9 }
 0x758   : > { %p1668_p1 = pnand %p1671_p13, %p1997_p3 }
 0x75a   : > { %1830 = dma.done.wait (!%p1668_p1), %s1300_s15, 768  }
 0x75b   : > { %1832 = vsyncadd (!%p1668_p1), %s1300_s15, 4294966528  ;;  %s27_s29 = sadd.s32 1, %s1863_s29   ;;  %s2361_s1 = sld [smem:[#allocation16_spill]] }
 0x75c   : > { %p24_p2 = scmp.ge.s32.totalorder %s27_s29, 10   ;;  %s2362_s24 = sld [smem:[#allocation21_spill]] }
 0x75d   : > { %s2363_s25 = sld [smem:[#allocation17_spill]]  ;;  %s2364_s26 = sld [smem:[#allocation18_spill]] }
 0x75e   : > { %s2365_s27 = sld [smem:[#allocation19_spill]]  ;;  %s2366_s28 = sld [smem:[#allocation20_spill]] }
 0x75f   : > { %s2367_s23 = smov %s1839_s0  ;;  %26 = sbr.rel (!%p24_p2) target bundleno = 22 (0x16), region = 120 }
 0x761   : > { %s2368_s0 = smov %s2361_s1 }
 0x766   :  { %1305 = vsyncpa [#allocation5], 1 }
 0x767   :  { %1307 = vsyncpa [#allocation5 + $0x1], 1 }
 0x768   :  { %1308 = vsyncpa [#allocation6], 1 }
 0x769   :  { %1310 = vsyncpa [#allocation6 + $0x1], 1 }

</bundles_post_ra>
